<compile_context>
chip_gen: v7x
topology: tpu7x:2x2x1
jax: 0.10.0
libtpu: 0.0.40
codegen_flags: <defaults>
</compile_context>

<pallas_src>
import functools
import math

import jax
import jax.numpy as jnp
from jax import lax
from jax.experimental import pallas as pl
from jax.experimental.pallas import tpu as pltpu

BN_EPS = 1e-5
K_W = 16            # conv1/conv2 kernel width (kernel_size=(1, 16)), stride 1
TARGET_TM = 512     # lanes per M tile (>=512 lanes reaches ~85% HBM roofline)
VMEM_LIMIT = 32 * 1024 * 1024


def _round_up(x, m):
    return (x + m - 1) // m * m


def _lcm(a, b):
    return a * b // math.gcd(a, b)


def _full_spec(shape):
    # Whole-array block (block shape == array shape satisfies TPU constraints).
    return pl.BlockSpec(shape, lambda i: (0,) * len(shape))


def _tile_spec(rows, tm):
    return pl.BlockSpec((rows, tm), lambda i: (0, i))


def _shifted_unroll(xt, k_w):
    """(C, TM) -> (K_W*C, TM); row block t holds xt shifted left by t lanes.

    The shift wraps within the tile; wrapped lanes only ever feed output
    columns with (col % W) >= W - K_W + 1, which are masked out downstream
    (tile boundaries are multiples of W), so the wrap is harmless.
    """
    parts = [xt]
    for t in range(1, k_w):
        parts.append(jnp.concatenate([xt[:, t:], xt[:, :t]], axis=-1))
    return jnp.concatenate(parts, axis=0)


def _col_mask(i, tm, w, m, wo):
    """(1, TM) bool mask of columns that are valid conv outputs (in-kernel)."""
    col = i * tm + lax.broadcasted_iota(jnp.int32, (1, tm), 1)
    return (col < m) & (col % w < wo)


# ---------------- pass 1: conv1 + bn1 statistics -----------------------------

def _conv1_stats_kernel(x_ref, w1_ref, acc1_ref, stats_ref, stat_sc,
                        *, k_w, w, m, wo):
    i = pl.program_id(0)
    tm = acc1_ref.shape[1]
    xu = _shifted_unroll(x_ref[...], k_w)                     # (K*Cin_p, TM)
    acc = jnp.dot(w1_ref[...], xu, preferred_element_type=jnp.float32)

    maskf = _col_mask(i, tm, w, m, wo).astype(jnp.float32)
    am = acc * maskf
    st = jnp.concatenate([jnp.sum(am, axis=1, keepdims=True),
                          jnp.sum(am * acc, axis=1, keepdims=True)], axis=1)

    @pl.when(i == 0)
    def _():
        stat_sc[...] = jnp.zeros_like(stat_sc)

    stat_sc[...] += st

    @pl.when(i == pl.num_programs(0) - 1)
    def _():
        stats_ref[...] = stat_sc[...]

    acc1_ref[...] = acc.astype(acc1_ref.dtype)


# ---------------- pass 2: bn1 + relu + conv2 + bn2 statistics ----------------

def _bn1_conv2_stats_kernel(acc1_ref, aff1_ref, w2_ref, acc2_ref, stats_ref,
                            stat_sc, *, k_w, w, m, wo):
    i = pl.program_id(0)
    tm = acc2_ref.shape[1]
    scale1 = aff1_ref[:, 0:1]
    shift1 = aff1_ref[:, 1:2]
    y1 = jnp.maximum(acc1_ref[...].astype(jnp.float32) * scale1 + shift1, 0.0)
    yu = _shifted_unroll(y1.astype(acc1_ref.dtype), k_w)      # (K*Cout_p, TM)
    acc = jnp.dot(w2_ref[...], yu, preferred_element_type=jnp.float32)

    maskf = _col_mask(i, tm, w, m, wo).astype(jnp.float32)
    am = acc * maskf
    st = jnp.concatenate([jnp.sum(am, axis=1, keepdims=True),
                          jnp.sum(am * acc, axis=1, keepdims=True)], axis=1)

    @pl.when(i == 0)
    def _():
        stat_sc[...] = jnp.zeros_like(stat_sc)

    stat_sc[...] += st

    @pl.when(i == pl.num_programs(0) - 1)
    def _():
        stats_ref[...] = stat_sc[...]

    acc2_ref[...] = acc.astype(acc2_ref.dtype)


# ---------------- pass 3: bn2 + W-pad + 1x1 shortcut + add + relu ------------

def _bn2_shortcut_kernel(x_ref, acc2_ref, w3_ref, prm_ref, o_ref, *, w, m, wo):
    i = pl.program_id(0)
    tm = o_ref.shape[1]
    scale2 = prm_ref[:, 0:1]
    shift2 = prm_ref[:, 1:2]
    b3 = prm_ref[:, 2:3]
    valid = _col_mask(i, tm, w, m, wo)                        # (1, TM) bool
    # In-kernel equivalent of F.pad(Y, (0, W - Wo2)): invalid columns -> 0.
    y2 = jnp.where(valid,
                   acc2_ref[...].astype(jnp.float32) * scale2 + shift2, 0.0)
    xres = jnp.dot(w3_ref[...], x_ref[...],
                   preferred_element_type=jnp.float32) + b3
    o_ref[...] = jnp.maximum(y2 + xres, 0.0).astype(o_ref.dtype)


# ---------------- wrapper -----------------------------------------------------

def _bn_affine(stats, gamma, beta, count):
    """(C,2) [sum, sumsq] -> (C,2) [scale, shift] for training-mode BN."""
    mu = stats[:, 0] / count
    var = jnp.maximum(stats[:, 1] / count - mu * mu, 0.0)
    scale = gamma * lax.rsqrt(var + BN_EPS)
    shift = beta - mu * scale
    return jnp.stack([scale, shift], axis=1)


def residual_forward(x_nchw, p, compute_dtype=jnp.float32):
    """Pallas implementation of Residual.forward (stride=1, conv3 present)."""
    n, c_in, h, w = x_nchw.shape
    c_out = p["w1"].shape[0]
    assert w >= 2 * (K_W - 1) + 1, "need W >= 31 for two valid (1,16) convs"
    wo1 = w - (K_W - 1)
    wo2 = wo1 - (K_W - 1)

    m = n * h * w
    c_in_p = _round_up(c_in, 8)
    c_out_p = _round_up(c_out, 8)

    # Tile size: multiple of 128 (lane-dense) AND of W (no cross-tile halo).
    quantum = _lcm(128, w)
    tm = max(quantum, TARGET_TM // quantum * quantum)
    g = pl.cdiv(m, tm)
    m_pad = g * tm

    cdt = compute_dtype
    f32 = jnp.float32

    # Transposed lane-dense layout: (C, N*H*W) with W innermost.
    x_t = jnp.transpose(x_nchw, (1, 0, 2, 3)).reshape(c_in, m)
    x_t = jnp.pad(x_t, ((0, c_in_p - c_in), (0, m_pad - m))).astype(cdt)

    def pack_w(wt, ci, ci_p):
        # (O, Ci, 1, K) -> (C_out_p, K*Ci_p); operand row index = t*Ci_p + c.
        wt = jnp.transpose(wt[:, :, 0, :], (0, 2, 1))          # (O, K, Ci)
        wt = jnp.pad(wt, ((0, c_out_p - wt.shape[0]), (0, 0), (0, ci_p - ci)))
        return wt.reshape(c_out_p, K_W * ci_p).astype(cdt)

    w1 = pack_w(p["w1"], c_in, c_in_p)
    w2 = pack_w(p["w2"], c_out, c_out_p)
    w3 = jnp.pad(p["w3"][:, :, 0, 0],
                 ((0, c_out_p - c_out), (0, c_in_p - c_in))).astype(cdt)

    def padc(v):
        return jnp.pad(v.astype(f32), (0, c_out_p - c_out))

    g1, be1, g2, be2, b3 = (padc(p[k]) for k in ("g1", "be1", "g2", "be2", "b3"))

    arb = pltpu.CompilerParams(dimension_semantics=("arbitrary",),
                               vmem_limit_bytes=VMEM_LIMIT)
    par = pltpu.CompilerParams(dimension_semantics=("parallel",),
                               vmem_limit_bytes=VMEM_LIMIT)

    # ---- pass 1: conv1 + bn1 sum/sumsq --------------------------------------
    acc1, st1 = pl.pallas_call(
        functools.partial(_conv1_stats_kernel, k_w=K_W, w=w, m=m, wo=wo1),
        grid=(g,),
        in_specs=[_tile_spec(c_in_p, tm), _full_spec((c_out_p, K_W * c_in_p))],
        out_specs=(_tile_spec(c_out_p, tm), _full_spec((c_out_p, 2))),
        out_shape=(jax.ShapeDtypeStruct((c_out_p, m_pad), cdt),
                   jax.ShapeDtypeStruct((c_out_p, 2), f32)),
        scratch_shapes=[pltpu.VMEM((c_out_p, 2), f32)],
        compiler_params=arb,
    )(x_t, w1)
    aff1 = _bn_affine(st1, g1, be1, float(n * h * wo1))        # (C_out_p, 2)

    # ---- pass 2: bn1 + relu + conv2 + bn2 sum/sumsq -------------------------
    acc2, st2 = pl.pallas_call(
        functools.partial(_bn1_conv2_stats_kernel, k_w=K_W, w=w, m=m, wo=wo2),
        grid=(g,),
        in_specs=[_tile_spec(c_out_p, tm), _full_spec((c_out_p, 2)),
                  _full_spec((c_out_p, K_W * c_out_p))],
        out_specs=(_tile_spec(c_out_p, tm), _full_spec((c_out_p, 2))),
        out_shape=(jax.ShapeDtypeStruct((c_out_p, m_pad), cdt),
                   jax.ShapeDtypeStruct((c_out_p, 2), f32)),
        scratch_shapes=[pltpu.VMEM((c_out_p, 2), f32)],
        compiler_params=arb,
    )(acc1, aff1, w2)
    aff2 = _bn_affine(st2, g2, be2, float(n * h * wo2))
    prm = jnp.concatenate([aff2, b3[:, None]], axis=1)         # (C_out_p, 3)

    # ---- pass 3: bn2 + W-pad + 1x1 shortcut + add + relu --------------------
    out_t = pl.pallas_call(
        functools.partial(_bn2_shortcut_kernel, w=w, m=m, wo=wo2),
        grid=(g,),
        in_specs=[_tile_spec(c_in_p, tm), _tile_spec(c_out_p, tm),
                  _full_spec((c_out_p, c_in_p)), _full_spec((c_out_p, 3))],
        out_specs=_tile_spec(c_out_p, tm),
        out_shape=jax.ShapeDtypeStruct((c_out_p, m_pad), f32),
        compiler_params=par,
    )(x_t, acc2, w3, prm)

    # (C_out, N*H*W) -> NCHW
    return out_t[:c_out, :m].reshape(c_out, n, h, w).transpose(1, 0, 2, 3)


# ---------------- pure-JAX reference (mirrors the PyTorch module) ------------

def _conv2d_nchw(x, w, b):
    y = lax.conv_general_dilated(x, w, window_strides=(1, 1), padding="VALID",
                                 dimension_numbers=("NCHW", "OIHW", "NCHW"))
    return y + b[None, :, None, None]


def _bn_train(x, gamma, beta):
    mu = jnp.mean(x, axis=(0, 2, 3), keepdims=True)
    var = jnp.mean((x - mu) ** 2, axis=(0, 2, 3), keepdims=True)
    return ((x - mu) * lax.rsqrt(var + BN_EPS) * gamma[None, :, None, None]
            + beta[None, :, None, None])


def residual_ref(x, p):
    y = _conv2d_nchw(x, p["w1"], p["b1"])
    y = jax.nn.relu(_bn_train(y, p["g1"], p["be1"]))
    y = _conv2d_nchw(y, p["w2"], p["b2"])
    y = _bn_train(y, p["g2"], p["be2"])
    x_res = _conv2d_nchw(x, p["w3"], p["b3"])
    w_diff = y.shape[3] - x_res.shape[3]   # < 0 here -> pad Y on the right in W
    y = jnp.pad(y, ((0, 0), (0, 0), (0, 0), (0, -w_diff)))
    return jax.nn.relu(y + x_res)


# ---------------- main --------------------------------------------------------

if __name__ == "__main__":
    # W >= 31 so both (1, 16) valid convs are non-empty; M = 1024 -> 2 M tiles.
    N, C_IN, C_OUT, H, W = 2, 4, 8, 8, 64

    key = jax.random.PRNGKey(0)
    ks = jax.random.split(key, 11)
    p = {
        "w1": 0.1 * jax.random.normal(ks[0], (C_OUT, C_IN, 1, K_W), jnp.float32),
        "b1": 0.1 * jax.random.normal(ks[1], (C_OUT,), jnp.float32),
        "w2": 0.1 * jax.random.normal(ks[2], (C_OUT, C_OUT, 1, K_W), jnp.float32),
        "b2": 0.1 * jax.random.normal(ks[3], (C_OUT,), jnp.float32),
        "w3": 0.1 * jax.random.normal(ks[4], (C_OUT, C_IN, 1, 1), jnp.float32),
        "b3": 0.1 * jax.random.normal(ks[5], (C_OUT,), jnp.float32),
        "g1": 1.0 + 0.1 * jax.random.normal(ks[6], (C_OUT,), jnp.float32),
        "be1": 0.1 * jax.random.normal(ks[7], (C_OUT,), jnp.float32),
        "g2": 1.0 + 0.1 * jax.random.normal(ks[8], (C_OUT,), jnp.float32),
        "be2": 0.1 * jax.random.normal(ks[9], (C_OUT,), jnp.float32),
    }
    x = jax.random.normal(ks[10], (N, C_IN, H, W), jnp.float32)

    ref = jax.block_until_ready(residual_ref(x, p))

    # f32 MXU-operand path: tight parity with the f32 reference.
    fwd_f32 = jax.jit(functools.partial(residual_forward,
                                        compute_dtype=jnp.float32))
    out_f32 = jax.block_until_ready(fwd_f32(x, p))
    assert out_f32.shape == (N, C_OUT, H, W), out_f32.shape
    assert jnp.allclose(out_f32, ref, atol=2e-4, rtol=2e-4), \
        float(jnp.max(jnp.abs(out_f32 - ref)))

    # bf16 MXU-operand path (f32 accumulation): relative-Frobenius check.
    fwd_bf16 = jax.jit(functools.partial(residual_forward,
                                         compute_dtype=jnp.bfloat16))
    out_bf16 = jax.block_until_ready(fwd_bf16(x, p))
    rel = float(jnp.linalg.norm(out_bf16 - ref) / jnp.linalg.norm(ref))
    assert rel < 0.05, rel

    print("KERNEL_OK")
</pallas_src>

<mosaic_0001>
module attributes {stable_mosaic.version = 11 : i64} {
  func.func @_conv1_stats_kernel(%arg0: i32, %arg1: memref<8x512xf32, #tpu.memory_space<vmem>>, %arg2: memref<8x128xf32, #tpu.memory_space<vmem>>, %arg3: memref<8x512xf32, #tpu.memory_space<vmem>>, %arg4: memref<8x2xf32, #tpu.memory_space<vmem>>, %arg5: memref<8x2xf32, #tpu.memory_space<vmem>>) attributes {dimension_semantics = [#tpu.dimension_semantics<arbitrary>], iteration_bounds = array<i64: 2>, scalar_prefetch = 0 : i64, scratch_operands = 1 : i64, tpu.core_type = #tpu.core_type<tc>, window_params = [{transform_indices = @transform_0, window_bounds = array<i64: 8, 512>}, {pipeline_mode = #tpu.pipeline_mode<synchronous>, transform_indices = @transform_1, window_bounds = array<i64: 8, 128>}, {transform_indices = @transform_2, window_bounds = array<i64: 8, 512>}, {pipeline_mode = #tpu.pipeline_mode<synchronous>, transform_indices = @transform_3, window_bounds = array<i64: 8, 2>}]} {
    %c0 = arith.constant 0 : index
    %c0_0 = arith.constant 0 : index
    %0 = vector.load %arg1[%c0, %c0_0] : memref<8x512xf32, #tpu.memory_space<vmem>>, vector<8x512xf32>
    %1 = vector.extract_strided_slice %0 {offsets = [0, 1], sizes = [8, 511], strides = [1, 1]} : vector<8x512xf32> to vector<8x511xf32>
    %2 = vector.extract_strided_slice %0 {offsets = [0, 0], sizes = [8, 1], strides = [1, 1]} : vector<8x512xf32> to vector<8x1xf32>
    %3 = tpu.concatenate %1, %2 in 1 : vector<8x511xf32>, vector<8x1xf32> -> vector<8x512xf32>
    %4 = vector.extract_strided_slice %0 {offsets = [0, 2], sizes = [8, 510], strides = [1, 1]} : vector<8x512xf32> to vector<8x510xf32>
    %5 = vector.extract_strided_slice %0 {offsets = [0, 0], sizes = [8, 2], strides = [1, 1]} : vector<8x512xf32> to vector<8x2xf32>
    %6 = tpu.concatenate %4, %5 in 1 : vector<8x510xf32>, vector<8x2xf32> -> vector<8x512xf32>
    %7 = vector.extract_strided_slice %0 {offsets = [0, 3], sizes = [8, 509], strides = [1, 1]} : vector<8x512xf32> to vector<8x509xf32>
    %8 = vector.extract_strided_slice %0 {offsets = [0, 0], sizes = [8, 3], strides = [1, 1]} : vector<8x512xf32> to vector<8x3xf32>
    %9 = tpu.concatenate %7, %8 in 1 : vector<8x509xf32>, vector<8x3xf32> -> vector<8x512xf32>
    %10 = vector.extract_strided_slice %0 {offsets = [0, 4], sizes = [8, 508], strides = [1, 1]} : vector<8x512xf32> to vector<8x508xf32>
    %11 = vector.extract_strided_slice %0 {offsets = [0, 0], sizes = [8, 4], strides = [1, 1]} : vector<8x512xf32> to vector<8x4xf32>
    %12 = tpu.concatenate %10, %11 in 1 : vector<8x508xf32>, vector<8x4xf32> -> vector<8x512xf32>
    %13 = vector.extract_strided_slice %0 {offsets = [0, 5], sizes = [8, 507], strides = [1, 1]} : vector<8x512xf32> to vector<8x507xf32>
    %14 = vector.extract_strided_slice %0 {offsets = [0, 0], sizes = [8, 5], strides = [1, 1]} : vector<8x512xf32> to vector<8x5xf32>
    %15 = tpu.concatenate %13, %14 in 1 : vector<8x507xf32>, vector<8x5xf32> -> vector<8x512xf32>
    %16 = vector.extract_strided_slice %0 {offsets = [0, 6], sizes = [8, 506], strides = [1, 1]} : vector<8x512xf32> to vector<8x506xf32>
    %17 = vector.extract_strided_slice %0 {offsets = [0, 0], sizes = [8, 6], strides = [1, 1]} : vector<8x512xf32> to vector<8x6xf32>
    %18 = tpu.concatenate %16, %17 in 1 : vector<8x506xf32>, vector<8x6xf32> -> vector<8x512xf32>
    %19 = vector.extract_strided_slice %0 {offsets = [0, 7], sizes = [8, 505], strides = [1, 1]} : vector<8x512xf32> to vector<8x505xf32>
    %20 = vector.extract_strided_slice %0 {offsets = [0, 0], sizes = [8, 7], strides = [1, 1]} : vector<8x512xf32> to vector<8x7xf32>
    %21 = tpu.concatenate %19, %20 in 1 : vector<8x505xf32>, vector<8x7xf32> -> vector<8x512xf32>
    %22 = vector.extract_strided_slice %0 {offsets = [0, 8], sizes = [8, 504], strides = [1, 1]} : vector<8x512xf32> to vector<8x504xf32>
    %23 = vector.extract_strided_slice %0 {offsets = [0, 0], sizes = [8, 8], strides = [1, 1]} : vector<8x512xf32> to vector<8x8xf32>
    %24 = tpu.concatenate %22, %23 in 1 : vector<8x504xf32>, vector<8x8xf32> -> vector<8x512xf32>
    %25 = vector.extract_strided_slice %0 {offsets = [0, 9], sizes = [8, 503], strides = [1, 1]} : vector<8x512xf32> to vector<8x503xf32>
    %26 = vector.extract_strided_slice %0 {offsets = [0, 0], sizes = [8, 9], strides = [1, 1]} : vector<8x512xf32> to vector<8x9xf32>
    %27 = tpu.concatenate %25, %26 in 1 : vector<8x503xf32>, vector<8x9xf32> -> vector<8x512xf32>
    %28 = vector.extract_strided_slice %0 {offsets = [0, 10], sizes = [8, 502], strides = [1, 1]} : vector<8x512xf32> to vector<8x502xf32>
    %29 = vector.extract_strided_slice %0 {offsets = [0, 0], sizes = [8, 10], strides = [1, 1]} : vector<8x512xf32> to vector<8x10xf32>
    %30 = tpu.concatenate %28, %29 in 1 : vector<8x502xf32>, vector<8x10xf32> -> vector<8x512xf32>
    %31 = vector.extract_strided_slice %0 {offsets = [0, 11], sizes = [8, 501], strides = [1, 1]} : vector<8x512xf32> to vector<8x501xf32>
    %32 = vector.extract_strided_slice %0 {offsets = [0, 0], sizes = [8, 11], strides = [1, 1]} : vector<8x512xf32> to vector<8x11xf32>
    %33 = tpu.concatenate %31, %32 in 1 : vector<8x501xf32>, vector<8x11xf32> -> vector<8x512xf32>
    %34 = vector.extract_strided_slice %0 {offsets = [0, 12], sizes = [8, 500], strides = [1, 1]} : vector<8x512xf32> to vector<8x500xf32>
    %35 = vector.extract_strided_slice %0 {offsets = [0, 0], sizes = [8, 12], strides = [1, 1]} : vector<8x512xf32> to vector<8x12xf32>
    %36 = tpu.concatenate %34, %35 in 1 : vector<8x500xf32>, vector<8x12xf32> -> vector<8x512xf32>
    %37 = vector.extract_strided_slice %0 {offsets = [0, 13], sizes = [8, 499], strides = [1, 1]} : vector<8x512xf32> to vector<8x499xf32>
    %38 = vector.extract_strided_slice %0 {offsets = [0, 0], sizes = [8, 13], strides = [1, 1]} : vector<8x512xf32> to vector<8x13xf32>
    %39 = tpu.concatenate %37, %38 in 1 : vector<8x499xf32>, vector<8x13xf32> -> vector<8x512xf32>
    %40 = vector.extract_strided_slice %0 {offsets = [0, 14], sizes = [8, 498], strides = [1, 1]} : vector<8x512xf32> to vector<8x498xf32>
    %41 = vector.extract_strided_slice %0 {offsets = [0, 0], sizes = [8, 14], strides = [1, 1]} : vector<8x512xf32> to vector<8x14xf32>
    %42 = tpu.concatenate %40, %41 in 1 : vector<8x498xf32>, vector<8x14xf32> -> vector<8x512xf32>
    %43 = vector.extract_strided_slice %0 {offsets = [0, 15], sizes = [8, 497], strides = [1, 1]} : vector<8x512xf32> to vector<8x497xf32>
    %44 = vector.extract_strided_slice %0 {offsets = [0, 0], sizes = [8, 15], strides = [1, 1]} : vector<8x512xf32> to vector<8x15xf32>
    %45 = tpu.concatenate %43, %44 in 1 : vector<8x497xf32>, vector<8x15xf32> -> vector<8x512xf32>
    %46 = tpu.concatenate %0, %3, %6, %9, %12, %15, %18, %21, %24, %27, %30, %33, %36, %39, %42, %45 in 0 : vector<8x512xf32>, vector<8x512xf32>, vector<8x512xf32>, vector<8x512xf32>, vector<8x512xf32>, vector<8x512xf32>, vector<8x512xf32>, vector<8x512xf32>, vector<8x512xf32>, vector<8x512xf32>, vector<8x512xf32>, vector<8x512xf32>, vector<8x512xf32>, vector<8x512xf32>, vector<8x512xf32>, vector<8x512xf32> -> vector<128x512xf32>
    %c0_1 = arith.constant 0 : index
    %c0_2 = arith.constant 0 : index
    %47 = vector.load %arg2[%c0_1, %c0_2] : memref<8x128xf32, #tpu.memory_space<vmem>>, vector<8x128xf32>
    %cst = arith.constant dense<0.000000e+00> : vector<8x512xf32>
    %48 = tpu.matmul %47, %46, %cst {dimension_numbers = #tpu.dot_dimension_numbers<[1], [0], [0], [1], [0, 0, 1, 1], [], []>} : vector<8x128xf32>, vector<128x512xf32>, vector<8x512xf32> -> vector<8x512xf32>
    %c512_i32 = arith.constant 512 : i32
    %49 = arith.muli %arg0, %c512_i32 : i32
    %50 = tpu.iota {dimensions = array<i32: 1>} : vector<1x512xi32>
    %51 = vector.broadcast %49 : i32 to vector<1x512xi32>
    %52 = arith.addi %51, %50 : vector<1x512xi32>
    %c1024_i32 = arith.constant 1024 : i32
    %53 = vector.broadcast %c1024_i32 : i32 to vector<1x512xi32>
    %54 = arith.cmpi slt, %52, %53 : vector<1x512xi32>
    %c64_i32 = arith.constant 64 : i32
    %c0_i32 = arith.constant 0 : i32
    %55 = arith.cmpi eq, %c64_i32, %c0_i32 : i32
    %c1_i32 = arith.constant 1 : i32
    %56 = arith.select %55, %c1_i32, %c64_i32 : i32
    %57 = vector.broadcast %56 : i32 to vector<1x512xi32>
    %58 = arith.remsi %52, %57 : vector<1x512xi32>
    %c0_i32_3 = arith.constant 0 : i32
    %59 = vector.broadcast %c0_i32_3 : i32 to vector<1x512xi32>
    %60 = arith.cmpi ne, %58, %59 : vector<1x512xi32>
    %c0_i32_4 = arith.constant 0 : i32
    %61 = vector.broadcast %c0_i32_4 : i32 to vector<1x512xi32>
    %62 = arith.cmpi slt, %58, %61 : vector<1x512xi32>
    %c0_i32_5 = arith.constant 0 : i32
    %63 = arith.cmpi slt, %56, %c0_i32_5 : i32
    %64 = vector.broadcast %63 : i1 to vector<1x512xi1>
    %65 = vector.broadcast %64 : vector<1x512xi1> to vector<1x512xi1>
    %66 = arith.xori %62, %65 : vector<1x512xi1>
    %67 = arith.andi %66, %60 : vector<1x512xi1>
    %68 = vector.broadcast %56 : i32 to vector<1x512xi32>
    %69 = arith.addi %58, %68 : vector<1x512xi32>
    %70 = arith.select %67, %69, %58 : vector<1x512xi1>, vector<1x512xi32>
    %c49_i32 = arith.constant 49 : i32
    %71 = vector.broadcast %c49_i32 : i32 to vector<1x512xi32>
    %72 = arith.cmpi slt, %70, %71 : vector<1x512xi32>
    %73 = arith.andi %54, %72 : vector<1x512xi1>
    %74 = arith.extui %73 : vector<1x512xi1> to vector<1x512xi32>
    %75 = arith.sitofp %74 : vector<1x512xi32> to vector<1x512xf32>
    %76 = vector.broadcast %75 : vector<1x512xf32> to vector<8x512xf32>
    %77 = arith.mulf %48, %76 : vector<8x512xf32>
    %cst_6 = arith.constant dense<0.000000e+00> : vector<8xf32>
    %78 = vector.multi_reduction <add>, %77, %cst_6 [1] : vector<8x512xf32> to vector<8xf32>
    %79 = vector.shape_cast %78 : vector<8xf32> to vector<8x1xf32>
    %80 = arith.mulf %77, %48 : vector<8x512xf32>
    %cst_7 = arith.constant dense<0.000000e+00> : vector<8xf32>
    %81 = vector.multi_reduction <add>, %80, %cst_7 [1] : vector<8x512xf32> to vector<8xf32>
    %82 = vector.shape_cast %81 : vector<8xf32> to vector<8x1xf32>
    %83 = tpu.concatenate %79, %82 in 1 : vector<8x1xf32>, vector<8x1xf32> -> vector<8x2xf32>
    %c0_i32_8 = arith.constant 0 : i32
    %84 = arith.cmpi eq, %arg0, %c0_i32_8 : i32
    %85 = arith.extui %84 : i1 to i32
    %c0_i32_9 = arith.constant 0 : i32
    %86 = arith.cmpi ne, %85, %c0_i32_9 : i32
    scf.if %86 {
      %cst_18 = arith.constant 0.000000e+00 : f32
      %94 = vector.broadcast %cst_18 : f32 to vector<8x2xf32>
      %c0_19 = arith.constant 0 : index
      %c0_20 = arith.constant 0 : index
      %95 = vector.load %arg5[%c0_19, %c0_20] : memref<8x2xf32, #tpu.memory_space<vmem>>, vector<8x2xf32>
      tpu.vector_store %arg5[%c0_19, %c0_20], %94 {strides = array<i32>} : memref<8x2xf32, #tpu.memory_space<vmem>>, vector<8x2xf32>,
    } else {
    }
    %c0_10 = arith.constant 0 : index
    %c0_11 = arith.constant 0 : index
    %87 = vector.load %arg5[%c0_10, %c0_11] : memref<8x2xf32, #tpu.memory_space<vmem>>, vector<8x2xf32>
    %88 = arith.addf %87, %83 : vector<8x2xf32>
    %c0_12 = arith.constant 0 : index
    %c0_13 = arith.constant 0 : index
    %89 = vector.load %arg5[%c0_12, %c0_13] : memref<8x2xf32, #tpu.memory_space<vmem>>, vector<8x2xf32>
    tpu.vector_store %arg5[%c0_12, %c0_13], %88 {strides = array<i32>} : memref<8x2xf32, #tpu.memory_space<vmem>>, vector<8x2xf32>,
    %c1_i32_14 = arith.constant 1 : i32
    %90 = arith.cmpi eq, %arg0, %c1_i32_14 : i32
    %91 = arith.extui %90 : i1 to i32
    %c0_i32_15 = arith.constant 0 : i32
    %92 = arith.cmpi ne, %91, %c0_i32_15 : i32
    scf.if %92 {
      %c0_18 = arith.constant 0 : index
      %c0_19 = arith.constant 0 : index
      %94 = vector.load %arg5[%c0_18, %c0_19] : memref<8x2xf32, #tpu.memory_space<vmem>>, vector<8x2xf32>
      %c0_20 = arith.constant 0 : index
      %c0_21 = arith.constant 0 : index
      %95 = vector.load %arg4[%c0_20, %c0_21] : memref<8x2xf32, #tpu.memory_space<vmem>>, vector<8x2xf32>
      tpu.vector_store %arg4[%c0_20, %c0_21], %94 {strides = array<i32>} : memref<8x2xf32, #tpu.memory_space<vmem>>, vector<8x2xf32>,
    } else {
    }
    %c0_16 = arith.constant 0 : index
    %c0_17 = arith.constant 0 : index
    %93 = vector.load %arg3[%c0_16, %c0_17] : memref<8x512xf32, #tpu.memory_space<vmem>>, vector<8x512xf32>
    tpu.vector_store %arg3[%c0_16, %c0_17], %48 {strides = array<i32>} : memref<8x512xf32, #tpu.memory_space<vmem>>, vector<8x512xf32>,
    return
  }
  func.func @transform_0(%arg0: i32) -> (i32, i32) {
    %c0_i32 = arith.constant 0 : i32
    %c0_i32_0 = arith.constant 0 : i32
    return %c0_i32, %arg0 : i32, i32
  }
  func.func @transform_1(%arg0: i32) -> (i32, i32) {
    %c0_i32 = arith.constant 0 : i32
    %c0_i32_0 = arith.constant 0 : i32
    %c0_i32_1 = arith.constant 0 : i32
    return %c0_i32, %c0_i32_0 : i32, i32
  }
  func.func @transform_2(%arg0: i32) -> (i32, i32) {
    %c0_i32 = arith.constant 0 : i32
    %c0_i32_0 = arith.constant 0 : i32
    return %c0_i32, %arg0 : i32, i32
  }
  func.func @transform_3(%arg0: i32) -> (i32, i32) {
    %c0_i32 = arith.constant 0 : i32
    %c0_i32_0 = arith.constant 0 : i32
    %c0_i32_1 = arith.constant 0 : i32
    return %c0_i32, %c0_i32_0 : i32, i32
  }
}

module attributes {stable_mosaic.version = 11 : i64} {
  func.func @_bn2_shortcut_kernel(%arg0: i32, %arg1: memref<8x512xf32, #tpu.memory_space<vmem>>, %arg2: memref<8x512xf32, #tpu.memory_space<vmem>>, %arg3: memref<8x8xf32, #tpu.memory_space<vmem>>, %arg4: memref<8x3xf32, #tpu.memory_space<vmem>>, %arg5: memref<8x512xf32, #tpu.memory_space<vmem>>) attributes {dimension_semantics = [#tpu.dimension_semantics<parallel>], iteration_bounds = array<i64: 2>, scalar_prefetch = 0 : i64, scratch_operands = 0 : i64, tpu.core_type = #tpu.core_type<tc>, window_params = [{transform_indices = @transform_0, window_bounds = array<i64: 8, 512>}, {transform_indices = @transform_1, window_bounds = array<i64: 8, 512>}, {pipeline_mode = #tpu.pipeline_mode<synchronous>, transform_indices = @transform_2, window_bounds = array<i64: 8, 8>}, {pipeline_mode = #tpu.pipeline_mode<synchronous>, transform_indices = @transform_3, window_bounds = array<i64: 8, 3>}, {transform_indices = @transform_4, window_bounds = array<i64: 8, 512>}]} {
    %c0 = arith.constant 0 : index
    %c0_0 = arith.constant 0 : index
    %0 = vector.load %arg4[%c0, %c0_0] : memref<8x3xf32, #tpu.memory_space<vmem>>, vector<8x1xf32>
    %c0_1 = arith.constant 0 : index
    %c1 = arith.constant 1 : index
    %1 = vector.load %arg4[%c0_1, %c1] : memref<8x3xf32, #tpu.memory_space<vmem>>, vector<8x1xf32>
    %c0_2 = arith.constant 0 : index
    %c2 = arith.constant 2 : index
    %2 = vector.load %arg4[%c0_2, %c2] : memref<8x3xf32, #tpu.memory_space<vmem>>, vector<8x1xf32>
    %c512_i32 = arith.constant 512 : i32
    %3 = arith.muli %arg0, %c512_i32 : i32
    %4 = tpu.iota {dimensions = array<i32: 1>} : vector<1x512xi32>
    %5 = vector.broadcast %3 : i32 to vector<1x512xi32>
    %6 = arith.addi %5, %4 : vector<1x512xi32>
    %c1024_i32 = arith.constant 1024 : i32
    %7 = vector.broadcast %c1024_i32 : i32 to vector<1x512xi32>
    %8 = arith.cmpi slt, %6, %7 : vector<1x512xi32>
    %c64_i32 = arith.constant 64 : i32
    %c0_i32 = arith.constant 0 : i32
    %9 = arith.cmpi eq, %c64_i32, %c0_i32 : i32
    %c1_i32 = arith.constant 1 : i32
    %10 = arith.select %9, %c1_i32, %c64_i32 : i32
    %11 = vector.broadcast %10 : i32 to vector<1x512xi32>
    %12 = arith.remsi %6, %11 : vector<1x512xi32>
    %c0_i32_3 = arith.constant 0 : i32
    %13 = vector.broadcast %c0_i32_3 : i32 to vector<1x512xi32>
    %14 = arith.cmpi ne, %12, %13 : vector<1x512xi32>
    %c0_i32_4 = arith.constant 0 : i32
    %15 = vector.broadcast %c0_i32_4 : i32 to vector<1x512xi32>
    %16 = arith.cmpi slt, %12, %15 : vector<1x512xi32>
    %c0_i32_5 = arith.constant 0 : i32
    %17 = arith.cmpi slt, %10, %c0_i32_5 : i32
    %18 = vector.broadcast %17 : i1 to vector<1x512xi1>
    %19 = vector.broadcast %18 : vector<1x512xi1> to vector<1x512xi1>
    %20 = arith.xori %16, %19 : vector<1x512xi1>
    %21 = arith.andi %20, %14 : vector<1x512xi1>
    %22 = vector.broadcast %10 : i32 to vector<1x512xi32>
    %23 = arith.addi %12, %22 : vector<1x512xi32>
    %24 = arith.select %21, %23, %12 : vector<1x512xi1>, vector<1x512xi32>
    %c34_i32 = arith.constant 34 : i32
    %25 = vector.broadcast %c34_i32 : i32 to vector<1x512xi32>
    %26 = arith.cmpi slt, %24, %25 : vector<1x512xi32>
    %27 = arith.andi %8, %26 : vector<1x512xi1>
    %c0_6 = arith.constant 0 : index
    %c0_7 = arith.constant 0 : index
    %28 = vector.load %arg2[%c0_6, %c0_7] : memref<8x512xf32, #tpu.memory_space<vmem>>, vector<8x512xf32>
    %29 = vector.broadcast %0 : vector<8x1xf32> to vector<8x512xf32>
    %30 = arith.mulf %28, %29 : vector<8x512xf32>
    %31 = vector.broadcast %1 : vector<8x1xf32> to vector<8x512xf32>
    %32 = arith.addf %30, %31 : vector<8x512xf32>
    %cst = arith.constant 0.000000e+00 : f32
    %33 = vector.shape_cast %27 : vector<1x512xi1> to vector<1x512xi1>
    %34 = vector.broadcast %33 : vector<1x512xi1> to vector<8x512xi1>
    %35 = vector.broadcast %cst : f32 to vector<8x512xf32>
    %36 = arith.select %34, %32, %35 : vector<8x512xi1>, vector<8x512xf32>
    %c0_8 = arith.constant 0 : index
    %c0_9 = arith.constant 0 : index
    %37 = vector.load %arg3[%c0_8, %c0_9] : memref<8x8xf32, #tpu.memory_space<vmem>>, vector<8x8xf32>
    %c0_10 = arith.constant 0 : index
    %c0_11 = arith.constant 0 : index
    %38 = vector.load %arg1[%c0_10, %c0_11] : memref<8x512xf32, #tpu.memory_space<vmem>>, vector<8x512xf32>
    %cst_12 = arith.constant dense<0.000000e+00> : vector<8x512xf32>
    %39 = tpu.matmul %37, %38, %cst_12 {dimension_numbers = #tpu.dot_dimension_numbers<[1], [0], [0], [1], [0, 0, 1, 1], [], []>} : vector<8x8xf32>, vector<8x512xf32>, vector<8x512xf32> -> vector<8x512xf32>
    %40 = vector.broadcast %2 : vector<8x1xf32> to vector<8x512xf32>
    %41 = arith.addf %39, %40 : vector<8x512xf32>
    %42 = arith.addf %36, %41 : vector<8x512xf32>
    %cst_13 = arith.constant 0.000000e+00 : f32
    %43 = vector.broadcast %cst_13 : f32 to vector<8x512xf32>
    %44 = arith.maximumf %42, %43 : vector<8x512xf32>
    %c0_14 = arith.constant 0 : index
    %c0_15 = arith.constant 0 : index
    %45 = vector.load %arg5[%c0_14, %c0_15] : memref<8x512xf32, #tpu.memory_space<vmem>>, vector<8x512xf32>
    tpu.vector_store %arg5[%c0_14, %c0_15], %44 {strides = array<i32>} : memref<8x512xf32, #tpu.memory_space<vmem>>, vector<8x512xf32>,
    return
  }
  func.func @transform_0(%arg0: i32) -> (i32, i32) {
    %c0_i32 = arith.constant 0 : i32
    %c0_i32_0 = arith.constant 0 : i32
    return %c0_i32, %arg0 : i32, i32
  }
  func.func @transform_1(%arg0: i32) -> (i32, i32) {
    %c0_i32 = arith.constant 0 : i32
    %c0_i32_0 = arith.constant 0 : i32
    return %c0_i32, %arg0 : i32, i32
  }
  func.func @transform_2(%arg0: i32) -> (i32, i32) {
    %c0_i32 = arith.constant 0 : i32
    %c0_i32_0 = arith.constant 0 : i32
    %c0_i32_1 = arith.constant 0 : i32
    return %c0_i32, %c0_i32_0 : i32, i32
  }
  func.func @transform_3(%arg0: i32) -> (i32, i32) {
    %c0_i32 = arith.constant 0 : i32
    %c0_i32_0 = arith.constant 0 : i32
    %c0_i32_1 = arith.constant 0 : i32
    return %c0_i32, %c0_i32_0 : i32, i32
  }
  func.func @transform_4(%arg0: i32) -> (i32, i32) {
    %c0_i32 = arith.constant 0 : i32
    %c0_i32_0 = arith.constant 0 : i32
    return %c0_i32, %arg0 : i32, i32
  }
}

module attributes {stable_mosaic.version = 11 : i64} {
  func.func @_bn1_conv2_stats_kernel(%arg0: i32, %arg1: memref<8x512xf32, #tpu.memory_space<vmem>>, %arg2: memref<8x2xf32, #tpu.memory_space<vmem>>, %arg3: memref<8x128xf32, #tpu.memory_space<vmem>>, %arg4: memref<8x512xf32, #tpu.memory_space<vmem>>, %arg5: memref<8x2xf32, #tpu.memory_space<vmem>>, %arg6: memref<8x2xf32, #tpu.memory_space<vmem>>) attributes {dimension_semantics = [#tpu.dimension_semantics<arbitrary>], iteration_bounds = array<i64: 2>, scalar_prefetch = 0 : i64, scratch_operands = 1 : i64, tpu.core_type = #tpu.core_type<tc>, window_params = [{transform_indices = @transform_0, window_bounds = array<i64: 8, 512>}, {pipeline_mode = #tpu.pipeline_mode<synchronous>, transform_indices = @transform_1, window_bounds = array<i64: 8, 2>}, {pipeline_mode = #tpu.pipeline_mode<synchronous>, transform_indices = @transform_2, window_bounds = array<i64: 8, 128>}, {transform_indices = @transform_3, window_bounds = array<i64: 8, 512>}, {pipeline_mode = #tpu.pipeline_mode<synchronous>, transform_indices = @transform_4, window_bounds = array<i64: 8, 2>}]} {
    %c0 = arith.constant 0 : index
    %c0_0 = arith.constant 0 : index
    %0 = vector.load %arg2[%c0, %c0_0] : memref<8x2xf32, #tpu.memory_space<vmem>>, vector<8x1xf32>
    %c0_1 = arith.constant 0 : index
    %c1 = arith.constant 1 : index
    %1 = vector.load %arg2[%c0_1, %c1] : memref<8x2xf32, #tpu.memory_space<vmem>>, vector<8x1xf32>
    %c0_2 = arith.constant 0 : index
    %c0_3 = arith.constant 0 : index
    %2 = vector.load %arg1[%c0_2, %c0_3] : memref<8x512xf32, #tpu.memory_space<vmem>>, vector<8x512xf32>
    %3 = vector.broadcast %0 : vector<8x1xf32> to vector<8x512xf32>
    %4 = arith.mulf %2, %3 : vector<8x512xf32>
    %5 = vector.broadcast %1 : vector<8x1xf32> to vector<8x512xf32>
    %6 = arith.addf %4, %5 : vector<8x512xf32>
    %cst = arith.constant 0.000000e+00 : f32
    %7 = vector.broadcast %cst : f32 to vector<8x512xf32>
    %8 = arith.maximumf %6, %7 : vector<8x512xf32>
    %9 = vector.extract_strided_slice %8 {offsets = [0, 1], sizes = [8, 511], strides = [1, 1]} : vector<8x512xf32> to vector<8x511xf32>
    %10 = vector.extract_strided_slice %8 {offsets = [0, 0], sizes = [8, 1], strides = [1, 1]} : vector<8x512xf32> to vector<8x1xf32>
    %11 = tpu.concatenate %9, %10 in 1 : vector<8x511xf32>, vector<8x1xf32> -> vector<8x512xf32>
    %12 = vector.extract_strided_slice %8 {offsets = [0, 2], sizes = [8, 510], strides = [1, 1]} : vector<8x512xf32> to vector<8x510xf32>
    %13 = vector.extract_strided_slice %8 {offsets = [0, 0], sizes = [8, 2], strides = [1, 1]} : vector<8x512xf32> to vector<8x2xf32>
    %14 = tpu.concatenate %12, %13 in 1 : vector<8x510xf32>, vector<8x2xf32> -> vector<8x512xf32>
    %15 = vector.extract_strided_slice %8 {offsets = [0, 3], sizes = [8, 509], strides = [1, 1]} : vector<8x512xf32> to vector<8x509xf32>
    %16 = vector.extract_strided_slice %8 {offsets = [0, 0], sizes = [8, 3], strides = [1, 1]} : vector<8x512xf32> to vector<8x3xf32>
    %17 = tpu.concatenate %15, %16 in 1 : vector<8x509xf32>, vector<8x3xf32> -> vector<8x512xf32>
    %18 = vector.extract_strided_slice %8 {offsets = [0, 4], sizes = [8, 508], strides = [1, 1]} : vector<8x512xf32> to vector<8x508xf32>
    %19 = vector.extract_strided_slice %8 {offsets = [0, 0], sizes = [8, 4], strides = [1, 1]} : vector<8x512xf32> to vector<8x4xf32>
    %20 = tpu.concatenate %18, %19 in 1 : vector<8x508xf32>, vector<8x4xf32> -> vector<8x512xf32>
    %21 = vector.extract_strided_slice %8 {offsets = [0, 5], sizes = [8, 507], strides = [1, 1]} : vector<8x512xf32> to vector<8x507xf32>
    %22 = vector.extract_strided_slice %8 {offsets = [0, 0], sizes = [8, 5], strides = [1, 1]} : vector<8x512xf32> to vector<8x5xf32>
    %23 = tpu.concatenate %21, %22 in 1 : vector<8x507xf32>, vector<8x5xf32> -> vector<8x512xf32>
    %24 = vector.extract_strided_slice %8 {offsets = [0, 6], sizes = [8, 506], strides = [1, 1]} : vector<8x512xf32> to vector<8x506xf32>
    %25 = vector.extract_strided_slice %8 {offsets = [0, 0], sizes = [8, 6], strides = [1, 1]} : vector<8x512xf32> to vector<8x6xf32>
    %26 = tpu.concatenate %24, %25 in 1 : vector<8x506xf32>, vector<8x6xf32> -> vector<8x512xf32>
    %27 = vector.extract_strided_slice %8 {offsets = [0, 7], sizes = [8, 505], strides = [1, 1]} : vector<8x512xf32> to vector<8x505xf32>
    %28 = vector.extract_strided_slice %8 {offsets = [0, 0], sizes = [8, 7], strides = [1, 1]} : vector<8x512xf32> to vector<8x7xf32>
    %29 = tpu.concatenate %27, %28 in 1 : vector<8x505xf32>, vector<8x7xf32> -> vector<8x512xf32>
    %30 = vector.extract_strided_slice %8 {offsets = [0, 8], sizes = [8, 504], strides = [1, 1]} : vector<8x512xf32> to vector<8x504xf32>
    %31 = vector.extract_strided_slice %8 {offsets = [0, 0], sizes = [8, 8], strides = [1, 1]} : vector<8x512xf32> to vector<8x8xf32>
    %32 = tpu.concatenate %30, %31 in 1 : vector<8x504xf32>, vector<8x8xf32> -> vector<8x512xf32>
    %33 = vector.extract_strided_slice %8 {offsets = [0, 9], sizes = [8, 503], strides = [1, 1]} : vector<8x512xf32> to vector<8x503xf32>
    %34 = vector.extract_strided_slice %8 {offsets = [0, 0], sizes = [8, 9], strides = [1, 1]} : vector<8x512xf32> to vector<8x9xf32>
    %35 = tpu.concatenate %33, %34 in 1 : vector<8x503xf32>, vector<8x9xf32> -> vector<8x512xf32>
    %36 = vector.extract_strided_slice %8 {offsets = [0, 10], sizes = [8, 502], strides = [1, 1]} : vector<8x512xf32> to vector<8x502xf32>
    %37 = vector.extract_strided_slice %8 {offsets = [0, 0], sizes = [8, 10], strides = [1, 1]} : vector<8x512xf32> to vector<8x10xf32>
    %38 = tpu.concatenate %36, %37 in 1 : vector<8x502xf32>, vector<8x10xf32> -> vector<8x512xf32>
    %39 = vector.extract_strided_slice %8 {offsets = [0, 11], sizes = [8, 501], strides = [1, 1]} : vector<8x512xf32> to vector<8x501xf32>
    %40 = vector.extract_strided_slice %8 {offsets = [0, 0], sizes = [8, 11], strides = [1, 1]} : vector<8x512xf32> to vector<8x11xf32>
    %41 = tpu.concatenate %39, %40 in 1 : vector<8x501xf32>, vector<8x11xf32> -> vector<8x512xf32>
    %42 = vector.extract_strided_slice %8 {offsets = [0, 12], sizes = [8, 500], strides = [1, 1]} : vector<8x512xf32> to vector<8x500xf32>
    %43 = vector.extract_strided_slice %8 {offsets = [0, 0], sizes = [8, 12], strides = [1, 1]} : vector<8x512xf32> to vector<8x12xf32>
    %44 = tpu.concatenate %42, %43 in 1 : vector<8x500xf32>, vector<8x12xf32> -> vector<8x512xf32>
    %45 = vector.extract_strided_slice %8 {offsets = [0, 13], sizes = [8, 499], strides = [1, 1]} : vector<8x512xf32> to vector<8x499xf32>
    %46 = vector.extract_strided_slice %8 {offsets = [0, 0], sizes = [8, 13], strides = [1, 1]} : vector<8x512xf32> to vector<8x13xf32>
    %47 = tpu.concatenate %45, %46 in 1 : vector<8x499xf32>, vector<8x13xf32> -> vector<8x512xf32>
    %48 = vector.extract_strided_slice %8 {offsets = [0, 14], sizes = [8, 498], strides = [1, 1]} : vector<8x512xf32> to vector<8x498xf32>
    %49 = vector.extract_strided_slice %8 {offsets = [0, 0], sizes = [8, 14], strides = [1, 1]} : vector<8x512xf32> to vector<8x14xf32>
    %50 = tpu.concatenate %48, %49 in 1 : vector<8x498xf32>, vector<8x14xf32> -> vector<8x512xf32>
    %51 = vector.extract_strided_slice %8 {offsets = [0, 15], sizes = [8, 497], strides = [1, 1]} : vector<8x512xf32> to vector<8x497xf32>
    %52 = vector.extract_strided_slice %8 {offsets = [0, 0], sizes = [8, 15], strides = [1, 1]} : vector<8x512xf32> to vector<8x15xf32>
    %53 = tpu.concatenate %51, %52 in 1 : vector<8x497xf32>, vector<8x15xf32> -> vector<8x512xf32>
    %54 = tpu.concatenate %8, %11, %14, %17, %20, %23, %26, %29, %32, %35, %38, %41, %44, %47, %50, %53 in 0 : vector<8x512xf32>, vector<8x512xf32>, vector<8x512xf32>, vector<8x512xf32>, vector<8x512xf32>, vector<8x512xf32>, vector<8x512xf32>, vector<8x512xf32>, vector<8x512xf32>, vector<8x512xf32>, vector<8x512xf32>, vector<8x512xf32>, vector<8x512xf32>, vector<8x512xf32>, vector<8x512xf32>, vector<8x512xf32> -> vector<128x512xf32>
    %c0_4 = arith.constant 0 : index
    %c0_5 = arith.constant 0 : index
    %55 = vector.load %arg3[%c0_4, %c0_5] : memref<8x128xf32, #tpu.memory_space<vmem>>, vector<8x128xf32>
    %cst_6 = arith.constant dense<0.000000e+00> : vector<8x512xf32>
    %56 = tpu.matmul %55, %54, %cst_6 {dimension_numbers = #tpu.dot_dimension_numbers<[1], [0], [0], [1], [0, 0, 1, 1], [], []>} : vector<8x128xf32>, vector<128x512xf32>, vector<8x512xf32> -> vector<8x512xf32>
    %c512_i32 = arith.constant 512 : i32
    %57 = arith.muli %arg0, %c512_i32 : i32
    %58 = tpu.iota {dimensions = array<i32: 1>} : vector<1x512xi32>
    %59 = vector.broadcast %57 : i32 to vector<1x512xi32>
    %60 = arith.addi %59, %58 : vector<1x512xi32>
    %c1024_i32 = arith.constant 1024 : i32
    %61 = vector.broadcast %c1024_i32 : i32 to vector<1x512xi32>
    %62 = arith.cmpi slt, %60, %61 : vector<1x512xi32>
    %c64_i32 = arith.constant 64 : i32
    %c0_i32 = arith.constant 0 : i32
    %63 = arith.cmpi eq, %c64_i32, %c0_i32 : i32
    %c1_i32 = arith.constant 1 : i32
    %64 = arith.select %63, %c1_i32, %c64_i32 : i32
    %65 = vector.broadcast %64 : i32 to vector<1x512xi32>
    %66 = arith.remsi %60, %65 : vector<1x512xi32>
    %c0_i32_7 = arith.constant 0 : i32
    %67 = vector.broadcast %c0_i32_7 : i32 to vector<1x512xi32>
    %68 = arith.cmpi ne, %66, %67 : vector<1x512xi32>
    %c0_i32_8 = arith.constant 0 : i32
    %69 = vector.broadcast %c0_i32_8 : i32 to vector<1x512xi32>
    %70 = arith.cmpi slt, %66, %69 : vector<1x512xi32>
    %c0_i32_9 = arith.constant 0 : i32
    %71 = arith.cmpi slt, %64, %c0_i32_9 : i32
    %72 = vector.broadcast %71 : i1 to vector<1x512xi1>
    %73 = vector.broadcast %72 : vector<1x512xi1> to vector<1x512xi1>
    %74 = arith.xori %70, %73 : vector<1x512xi1>
    %75 = arith.andi %74, %68 : vector<1x512xi1>
    %76 = vector.broadcast %64 : i32 to vector<1x512xi32>
    %77 = arith.addi %66, %76 : vector<1x512xi32>
    %78 = arith.select %75, %77, %66 : vector<1x512xi1>, vector<1x512xi32>
    %c34_i32 = arith.constant 34 : i32
    %79 = vector.broadcast %c34_i32 : i32 to vector<1x512xi32>
    %80 = arith.cmpi slt, %78, %79 : vector<1x512xi32>
    %81 = arith.andi %62, %80 : vector<1x512xi1>
    %82 = arith.extui %81 : vector<1x512xi1> to vector<1x512xi32>
    %83 = arith.sitofp %82 : vector<1x512xi32> to vector<1x512xf32>
    %84 = vector.broadcast %83 : vector<1x512xf32> to vector<8x512xf32>
    %85 = arith.mulf %56, %84 : vector<8x512xf32>
    %cst_10 = arith.constant dense<0.000000e+00> : vector<8xf32>
    %86 = vector.multi_reduction <add>, %85, %cst_10 [1] : vector<8x512xf32> to vector<8xf32>
    %87 = vector.shape_cast %86 : vector<8xf32> to vector<8x1xf32>
    %88 = arith.mulf %85, %56 : vector<8x512xf32>
    %cst_11 = arith.constant dense<0.000000e+00> : vector<8xf32>
    %89 = vector.multi_reduction <add>, %88, %cst_11 [1] : vector<8x512xf32> to vector<8xf32>
    %90 = vector.shape_cast %89 : vector<8xf32> to vector<8x1xf32>
    %91 = tpu.concatenate %87, %90 in 1 : vector<8x1xf32>, vector<8x1xf32> -> vector<8x2xf32>
    %c0_i32_12 = arith.constant 0 : i32
    %92 = arith.cmpi eq, %arg0, %c0_i32_12 : i32
    %93 = arith.extui %92 : i1 to i32
    %c0_i32_13 = arith.constant 0 : i32
    %94 = arith.cmpi ne, %93, %c0_i32_13 : i32
    scf.if %94 {
      %cst_22 = arith.constant 0.000000e+00 : f32
      %102 = vector.broadcast %cst_22 : f32 to vector<8x2xf32>
      %c0_23 = arith.constant 0 : index
      %c0_24 = arith.constant 0 : index
      %103 = vector.load %arg6[%c0_23, %c0_24] : memref<8x2xf32, #tpu.memory_space<vmem>>, vector<8x2xf32>
      tpu.vector_store %arg6[%c0_23, %c0_24], %102 {strides = array<i32>} : memref<8x2xf32, #tpu.memory_space<vmem>>, vector<8x2xf32>,
    } else {
    }
    %c0_14 = arith.constant 0 : index
    %c0_15 = arith.constant 0 : index
    %95 = vector.load %arg6[%c0_14, %c0_15] : memref<8x2xf32, #tpu.memory_space<vmem>>, vector<8x2xf32>
    %96 = arith.addf %95, %91 : vector<8x2xf32>
    %c0_16 = arith.constant 0 : index
    %c0_17 = arith.constant 0 : index
    %97 = vector.load %arg6[%c0_16, %c0_17] : memref<8x2xf32, #tpu.memory_space<vmem>>, vector<8x2xf32>
    tpu.vector_store %arg6[%c0_16, %c0_17], %96 {strides = array<i32>} : memref<8x2xf32, #tpu.memory_space<vmem>>, vector<8x2xf32>,
    %c1_i32_18 = arith.constant 1 : i32
    %98 = arith.cmpi eq, %arg0, %c1_i32_18 : i32
    %99 = arith.extui %98 : i1 to i32
    %c0_i32_19 = arith.constant 0 : i32
    %100 = arith.cmpi ne, %99, %c0_i32_19 : i32
    scf.if %100 {
      %c0_22 = arith.constant 0 : index
      %c0_23 = arith.constant 0 : index
      %102 = vector.load %arg6[%c0_22, %c0_23] : memref<8x2xf32, #tpu.memory_space<vmem>>, vector<8x2xf32>
      %c0_24 = arith.constant 0 : index
      %c0_25 = arith.constant 0 : index
      %103 = vector.load %arg5[%c0_24, %c0_25] : memref<8x2xf32, #tpu.memory_space<vmem>>, vector<8x2xf32>
      tpu.vector_store %arg5[%c0_24, %c0_25], %102 {strides = array<i32>} : memref<8x2xf32, #tpu.memory_space<vmem>>, vector<8x2xf32>,
    } else {
    }
    %c0_20 = arith.constant 0 : index
    %c0_21 = arith.constant 0 : index
    %101 = vector.load %arg4[%c0_20, %c0_21] : memref<8x512xf32, #tpu.memory_space<vmem>>, vector<8x512xf32>
    tpu.vector_store %arg4[%c0_20, %c0_21], %56 {strides = array<i32>} : memref<8x512xf32, #tpu.memory_space<vmem>>, vector<8x512xf32>,
    return
  }
  func.func @transform_0(%arg0: i32) -> (i32, i32) {
    %c0_i32 = arith.constant 0 : i32
    %c0_i32_0 = arith.constant 0 : i32
    return %c0_i32, %arg0 : i32, i32
  }
  func.func @transform_1(%arg0: i32) -> (i32, i32) {
    %c0_i32 = arith.constant 0 : i32
    %c0_i32_0 = arith.constant 0 : i32
    %c0_i32_1 = arith.constant 0 : i32
    return %c0_i32, %c0_i32_0 : i32, i32
  }
  func.func @transform_2(%arg0: i32) -> (i32, i32) {
    %c0_i32 = arith.constant 0 : i32
    %c0_i32_0 = arith.constant 0 : i32
    %c0_i32_1 = arith.constant 0 : i32
    return %c0_i32, %c0_i32_0 : i32, i32
  }
  func.func @transform_3(%arg0: i32) -> (i32, i32) {
    %c0_i32 = arith.constant 0 : i32
    %c0_i32_0 = arith.constant 0 : i32
    return %c0_i32, %arg0 : i32, i32
  }
  func.func @transform_4(%arg0: i32) -> (i32, i32) {
    %c0_i32 = arith.constant 0 : i32
    %c0_i32_0 = arith.constant 0 : i32
    %c0_i32_1 = arith.constant 0 : i32
    return %c0_i32, %c0_i32_0 : i32, i32
  }
}

</mosaic_0001>

<bundles_post_ra>
// kernel: residual_forward.5
= control target key start
LH: loop header
LB: loop body
LE: loop exit
PB: predicated region body
PF: predicated region fallthrough
CT: control target
= control target key end

     0   :  { %s636_s15 = smov 0   ;;  %s737_s0 = inlined_call_operand.vmem [shape: f32[8,1024], index: 0, kind: input, shape index: {}]   ;;  %s738_s1 = inlined_call_operand.vmem [shape: f32[8,1024], index: 1, kind: input, shape index: {}]   ;;  %s739_s2 = inlined_call_operand.vmem [shape: f32[8,8], index: 2, kind: input, shape index: {}]   ;;  %s740_s3 = inlined_call_operand.vmem [shape: f32[8,3], index: 3, kind: input, shape index: {}]   ;;  %s741_s4 = inlined_call_operand.vmem [shape: f32[8,1024], index: 4, kind: output, shape index: {}]  }
   0x1 LB: > { %s563_s16 = sadd.s32 4294967295, %s605_s15   ;;  %p567_p0 = scmp.ge.s32.totalorder %s605_s15, 1  ;;  %s605_s15 = sphi %s636_s15, %s14_s15  }
   0x2   : > { %p174_p1 = scmp.lt.s32.totalorder %s605_s15, 3 }
   0x4   : > { %p175_p2 = pnand %p567_p0, %p174_p1 }
   0x5   : > { %s568_s17 = sshll.u32 (!%p175_p2), %s563_s16, 2  ;;  %v223_v0 = vld [vmem:[%s740_s3] sm:$0xff] (!%p175_p2)  ;;  %v607_v1 = vmov (!%p175_p2), 0.0   ;;  %v608_v2 = vmov (!%p175_p2), 0   ;;  %v609_v3 = vmov (!%p175_p2), 2   ;;  %vm337_vm0 = vcmask (!%p175_p2), 64512  }
   0x6   : > { %178 = sbr.rel (%p175_p2) target bundleno = 239 (0xef), region = 36  ;;  %p206_p3 = scmp.lt.s32.totalorder (!%p175_p2), %s568_s17, 7  ;;  %405 = vmatprep.mubr.f32.mxu0 (!%p175_p2), %v607_v1  ;;  %476 = vmatprep.mubr.f32.mxu1 (!%p175_p2), %v607_v1  ;;  %v328_v4 = vld [vmem:[%s739_s2] sm:$0xff] (!%p175_p2)  ;;  %v610_v8 = vmov (!%p175_p2), 1   ;;  %v225_v10 = vlaneseq (!%p175_p2) }
   0x7   : > { %595 = vset.pattern.permute.xlu0 (!%p175_p2), %v608_v2  ;;  %597 = vset.pattern.permute.xlu1 (!%p175_p2), %v609_v3  ;;  %s574_s26 = sshll.u32 (!%p175_p2), %s563_s16, 9 }
   0x8   : > { %301 = vperm.xlu0 (!%p175_p2), %595, %v223_v0   ;;  %334 = vperm.xlu1 (!%p175_p2), %597, %v223_v0   ;;  %v226_v11 = vand.u32 (!%p175_p2), 127, %v225_v10  ;;  %v230_v12 = vstv (!%p175_p2), %s574_s26 }
   0xa   : > { %v228_v13 = vadd.s32 (!%p175_p2), 256, %v226_v11  ;;  %v227_v14 = vadd.s32 (!%p175_p2), 128, %v226_v11  ;;  %v229_v15 = vadd.s32 (!%p175_p2), 384, %v226_v11  ;;  %v660_v16 = vadd.s32 (!%p175_p2), %v230_v12, %v226_v11 }
   0xc   : > { %596 = vset.pattern.permute.xlu0 (!%p175_p2), %v610_v8  ;;  %v662_v17 = vadd.s32 (!%p175_p2), %v230_v12, %v228_v13  ;;  %v664_v18 = vadd.s32 (!%p175_p2), %v230_v12, %v227_v14  ;;  %v666_v19 = vadd.s32 (!%p175_p2), %v230_v12, %v229_v15  ;;  %v240_v20 = vsub.s32 (!%p175_p2), 0, %v660_v16 }
   0xd   : > { %s757_s17 = smov (!%p206_p3, %s568_s17), 7  ;;  %309 = vperm.xlu0 %596, %v223_v0   ;;  %vm239_vm1 = vcmp.lt.s32.totalorder %v660_v16, 0 }
   0xe   : > { %s649_s20 = sshll.u32 %s757_s17, 3  ;;  %v254_v21 = vsub.s32 0, %v662_v17  ;;  %v247_v22 = vsub.s32 0, %v664_v18  ;;  %v261_v23 = vsub.s32 0, %v666_v19  ;;  %v575_v24 = vmin.u32 %v240_v20, %v660_v16 }
   0xf   : > { %s209_s23 = scalar_lea.vmem %s737_s0, %s649_s20  ;;  %vm253_vm2 = vcmp.lt.s32.totalorder %v662_v17, 0  ;;  %vm246_vm3 = vcmp.lt.s32.totalorder %v664_v18, 0  ;;  %vm260_vm4 = vcmp.lt.s32.totalorder %v666_v19, 0  ;;  %s215_s29 = scalar_lea.vmem %s738_s1, %s649_s20 }
  0x10   : > { %v330_v5 = vld [vmem:[%s209_s23 + $0x8] sm:$0xff]  ;;  %v332_v6 = vld [vmem:[%s209_s23 + $0x18] sm:$0xff]  ;;  %v329_v7 = vld [vmem:[%s209_s23] sm:$0xff]  ;;  %v577_v25 = vmin.u32 %v254_v21, %v662_v17  ;;  %v576_v26 = vmin.u32 %v247_v22, %v664_v18  ;;  %v578_v27 = vmin.u32 %v261_v23, %v666_v19  ;;  %v243_v28 = vand.u32 63, %v575_v24  ;;  %s221_s6 = scalar_lea.vmem %s741_s4, %s649_s20 }
  0x11   : > { %341 = vmatprep.subr.mxu0 %v330_v5  ;;  %412 = vmatprep.subr.mxu1 %v332_v6  ;;  %v331_v9 = vld [vmem:[%s209_s23 + $0x10] sm:$0xff]  ;;  %v295_v48 = vld [vmem:[%s215_s29] sm:$0xff]  ;;  %v296_v52 = vld [vmem:[%s215_s29 + $0x8] sm:$0xff] }
  0x12   : > { %342 = vmatpush1.msra.mxu0 %v329_v7  ;;  %413 = vmatpush1.msra.mxu1 %v331_v9  ;;  %v257_v29 = vand.u32 63, %v577_v25  ;;  %v250_v30 = vand.u32 63, %v576_v26  ;;  %v264_v31 = vand.u32 63, %v578_v27  ;;  %v244_v32 = vsub.s32 0, %v243_v28  ;;  %v297_v49 = vld [vmem:[%s215_s29 + $0x10] sm:$0xff]  ;;  %v298_v53 = vld [vmem:[%s215_s29 + $0x18] sm:$0xff] }
  0x13   : > { %579 = vmatmul.mubr.msk.f32.vlgmr.msra.gmra.mrb[0].mxu0 %vm337_vm0, %v328_v4  ;;  %580 = vmatmul.mubr.msk.f32.vlgmr.msra.gmra.mrb[0].mxu1 %vm337_vm0, %v328_v4 }
  0x14   : > { %598 = vset.pattern.permute.xlu0 %v609_v3  ;;  %v258_v33 = vsub.s32 0, %v257_v29  ;;  %v251_v34 = vsub.s32 0, %v250_v30  ;;  %v265_v35 = vsub.s32 0, %v264_v31  ;;  %v245_v36 = vsel %vm239_vm1, %v244_v32, %v243_v28 }
  0x15   : > { %vm267_vm5 = vcmp.ne.s32.totalorder %v245_v36, 0  ;;  %vm271_vm6 = vcmp.lt.s32.totalorder %v245_v36, 0  ;;  %v279_v40 = vadd.s32 64, %v245_v36  ;;  %vm235_vm1 = vcmp.lt.s32.totalorder %v660_v16, 1024 }
  0x16   : > { %v259_v37 = vsel %vm253_vm2, %v258_v33, %v257_v29  ;;  %v252_v38 = vsel %vm246_vm3, %v251_v34, %v250_v30  ;;  %v266_v39 = vsel %vm260_vm4, %v265_v35, %v264_v31  ;;  %vm684_vm11 = vmand %vm271_vm6, %vm267_vm5  ;;  %vm237_vm3 = vcmp.lt.s32.totalorder %v662_v17, 1024 }
  0x17   : > { %vm269_vm7 = vcmp.ne.s32.totalorder %v259_v37, 0  ;;  %vm273_vm8 = vcmp.lt.s32.totalorder %v259_v37, 0  ;;  %vm268_vm9 = vcmp.ne.s32.totalorder %v252_v38, 0  ;;  %vm272_vm10 = vcmp.lt.s32.totalorder %v252_v38, 0 }
  0x18   : > { %v281_v42 = vadd.s32 64, %v259_v37  ;;  %vm270_vm12 = vcmp.ne.s32.totalorder %v266_v39, 0  ;;  %vm274_vm13 = vcmp.lt.s32.totalorder %v266_v39, 0  ;;  %vm688_vm14 = vmand %vm273_vm8, %vm269_vm7  ;;  %v280_v45 = vadd.s32 64, %v252_v38 }
  0x19   : > { %vm692_vm15 = vmand %vm272_vm10, %vm268_vm9  ;;  %v282_v47 = vadd.s32 64, %v266_v39  ;;  %v283_v50 = vsel %vm684_vm11, %v279_v40, %v245_v36  ;;  %vm236_vm5 = vcmp.lt.s32.totalorder %v664_v18, 1024  ;;  %vm238_vm8 = vcmp.lt.s32.totalorder %v666_v19, 1024 }
  0x1a   : > { %vm698_vm0 = vmand %vm274_vm13, %vm270_vm12  ;;  %v285_v54 = vsel %vm688_vm14, %v281_v42, %v259_v37  ;;  %v284_v55 = vsel %vm692_vm15, %v280_v45, %v252_v38  ;;  %vm287_vm2 = vcmp.lt.s32.totalorder %v283_v50, 34 }
  0x1b   : > { %v286_v58 = vsel %vm698_vm0, %v282_v47, %v266_v39  ;;  %vm289_vm4 = vcmp.lt.s32.totalorder %v285_v54, 34  ;;  %vm288_vm6 = vcmp.lt.s32.totalorder %v284_v55, 34  ;;  %vm711_vm7 = vmand %vm235_vm1, %vm287_vm2 }
  0x1c   : > { %vm290_vm9 = vcmp.lt.s32.totalorder %v286_v58, 34  ;;  %vm716_vm10 = vmand %vm237_vm3, %vm289_vm4 }
  0x1d   : > { %vm720_vm11 = vmand %vm236_vm5, %vm288_vm6 }
  0x1e   : > { %vm294_vm12 = vmand %vm238_vm8, %vm290_vm9 }
  0x87   : > { %v302_v43 = vpop.permute.xlu0 %301  ;;  %v335_v1 = vpop.permute.xlu1 %334 }
  0x88   : > { %v304_v56 = vmul.f32 %v302_v43, %v295_v48  ;;  %v306_v57 = vmul.f32 %v302_v43, %v297_v49  ;;  %v305_v60 = vmul.f32 %v302_v43, %v296_v52  ;;  %v307_v61 = vmul.f32 %v302_v43, %v298_v53 }
  0x8c   : > { %v310_v59 = vpop.permute.xlu0 %309 }
  0x8d   : > { %v312_v63 = vadd.f32 %v310_v59, %v304_v56  ;;  %v314_v0 = vadd.f32 %v310_v59, %v306_v57  ;;  %v313_v3 = vadd.f32 %v310_v59, %v305_v60  ;;  %v315_v4 = vadd.f32 %v310_v59, %v307_v61 }
  0x8f   : > { %v324_v12 = vsel %vm711_vm7, %v312_v63, 0.0  ;;  %v326_v13 = vsel %vm716_vm10, %v314_v0, 0.0  ;;  %v325_v18 = vsel %vm720_vm11, %v313_v3, 0.0  ;;  %v327_v19 = vsel %vm294_vm12, %v315_v4, 0.0 }
  0xe6   : > { %v407_v6 = vpop.f32.mrb[0].mxu0  ;;  %v478_v7 = vpop.f32.mrb[0].mxu1 }
  0xe7   : > { %v408_v8 = vadd.f32 %v407_v6, %v335_v1  ;;  %v479_v9 = vadd.f32 %v478_v7, %v335_v1  ;;  %v409_v10 = vpop.f32.mrb[1].mxu0  ;;  %v480_v11 = vpop.f32.mrb[1].mxu1 }
  0xe8   : > { %v410_v14 = vadd.f32 %v409_v10, %v335_v1  ;;  %v481_v15 = vadd.f32 %v480_v11, %v335_v1 }
  0xe9   : > { %v483_v16 = vadd.f32 %v408_v8, %v324_v12  ;;  %v485_v17 = vadd.f32 %v479_v9, %v326_v13 }
  0xea   : > { %v484_v20 = vadd.f32 %v410_v14, %v325_v18  ;;  %v486_v21 = vadd.f32 %v481_v15, %v327_v19 }
  0xeb   : > { %v487_v22 = vmax.f32 %v483_v16, 0.0  ;;  %v489_v24 = vmax.f32 %v485_v17, 0.0 }
  0xec   : > { %v488_v23 = vmax.f32 %v484_v20, 0.0  ;;  %v490_v25 = vmax.f32 %v486_v21, 0.0 }
  0xed   : > { %491 = vst [vmem:[%s221_s6] sm:$0xff] %v487_v22  ;;  %493 = vst [vmem:[%s221_s6 + $0x10] sm:$0xff] %v489_v24 }
  0xee   : > { %492 = vst [vmem:[%s221_s6 + $0x8] sm:$0xff] %v488_v23  ;;  %494 = vst [vmem:[%s221_s6 + $0x18] sm:$0xff] %v490_v25 }
  0xef PF: > { %s14_s15 = sadd.s32 1, %s605_s15  }
  0xf0   : > { %p11_p4 = scmp.ge.s32.totalorder %s14_s15, 4  }
  0xf2   :  { %13 = sbr.rel (!%p11_p4) target bundleno = 1 (0x1), region = 69 }

// kernel: residual_forward.4
= control target key start
LH: loop header
LB: loop body
LE: loop exit
PB: predicated region body
PF: predicated region fallthrough
CT: control target
= control target key end

     0   :  { %s1135_s15 = smov 0   ;;  %s1259_s0 = inlined_call_operand.vmem [shape: f32[8,1024], index: 0, kind: input, shape index: {}]   ;;  %s1260_s1 = inlined_call_operand.vmem [shape: f32[8,2], index: 1, kind: input, shape index: {}]   ;;  %s1261_s2 = inlined_call_operand.vmem [shape: f32[8,128], index: 2, kind: input, shape index: {}]   ;;  %s1262_s3 = inlined_call_operand.vmem [shape: f32[8,1024], index: 3, kind: output, shape index: {0}]   ;;  %s1263_s4 = inlined_call_operand.vmem [shape: f32[8,2], index: 4, kind: output, shape index: {1}]  }
   0x1 LB: > { %s1141_s16 = sadd.s32 4294967295, %s1089_s15   ;;  %p827_p0 = scmp.ge.s32.totalorder %s1089_s15, 1  ;;  %s1089_s15 = sphi %s1135_s15, %s15_s15  }
   0x2   : > { %p161_p1 = scmp.lt.s32.totalorder %s1089_s15, 3 }
   0x4   : > { %p162_p2 = pnand %p827_p0, %p161_p1 }
   0x5   : > { %v199_v0 = vld [vmem:[%s1260_s1] sm:$0xff] (!%p162_p2)  ;;  %s828_s19 = sshll.u32 (!%p162_p2), %s1141_s16, 2  ;;  %v1091_v1 = vmov (!%p162_p2), 0   ;;  %v1092_v2 = vmov (!%p162_p2), 1   ;;  %s1093_s27 = smov (!%p162_p2), 125   ;;  %v1107_v23 = vmov (!%p162_p2), 0.0  }
   0x6   : > { %165 = sbr.rel (%p162_p2) target bundleno = 709 (0x2c5), region = 32  ;;  %936 = vset.pattern.permute.xlu0 (!%p162_p2), %v1091_v1  ;;  %p188_p3 = scmp.lt.s32.totalorder (!%p162_p2), %s828_s19, 7  ;;  %564 = vmatprep.mubr.f32.mxu0 (!%p162_p2), %v1107_v23  ;;  %vm237_vm0 = vcmask (!%p162_p2), 1039360   ;;  %vm273_vm1 = vcmask (!%p162_p2), 1022976   ;;  %vm255_vm2 = vcmask (!%p162_p2), 1031168   ;;  %vm309_vm3 = vcmask (!%p162_p2), 1006592  }
   0x7   : > { %206 = vperm.xlu0 (!%p162_p2), %936, %v199_v0   ;;  %s1094_s28 = smov (!%p162_p2), 127   ;;  %s1095_s29 = smov (!%p162_p2), 123   ;;  %635 = vmatprep.mubr.f32.mxu1 (!%p162_p2), %v1107_v23  ;;  %vm291_vm4 = vcmask (!%p162_p2), 1014784   ;;  %vm345_vm5 = vcmask (!%p162_p2), 990208   ;;  %vm327_vm6 = vcmask (!%p162_p2), 998400   ;;  %vm381_vm7 = vcmask (!%p162_p2), 973824  }
   0x8   : > { %s1096_s30 = smov (!%p162_p2), 126   ;;  %s1097_s5 = smov (!%p162_p2), 121   ;;  %vm363_vm8 = vcmask (!%p162_p2), 982016   ;;  %vm417_vm9 = vcmask (!%p162_p2), 957440   ;;  %vm399_vm10 = vcmask (!%p162_p2), 965632   ;;  %vm453_vm11 = vcmask (!%p162_p2), 941056  }
   0x9   : > { %s1098_s6 = smov (!%p162_p2), 124   ;;  %s1099_s7 = smov (!%p162_p2), 119   ;;  %vm435_vm12 = vcmask (!%p162_p2), 949248   ;;  %vm489_vm13 = vcmask (!%p162_p2), 924672   ;;  %vm471_vm14 = vcmask (!%p162_p2), 932864  }
   0xa   : > { %s1100_s8 = smov (!%p162_p2), 122   ;;  %s1101_s9 = smov (!%p162_p2), 117  }
   0xb   : > { %937 = vset.pattern.permute.xlu0 (!%p162_p2), %v1092_v2  ;;  %s1102_s10 = smov (!%p162_p2), 120   ;;  %s1103_s11 = smov (!%p162_p2), 115  }
   0xc   : > { %214 = vperm.xlu0 (!%p162_p2), %937, %v199_v0   ;;  %s1104_s12 = smov (!%p162_p2), 118   ;;  %s1105_s13 = smov (!%p162_p2), 113  }
   0xd   : > { %s1265_s19 = smov (!%p188_p3, %s828_s19), 7  ;;  %s1106_s14 = smov 116  }
   0xe   : > { %s829_s20 = sshll.u32 %s1265_s19, 3  ;;  %s1108_s17 = smov 114  }
   0xf   : > { %s1152_s23 = scalar_lea.vmem %s1262_s3, %s829_s20  ;;  %s191_s26 = scalar_lea.vmem %s1259_s0, %s829_s20 }
  0x10   : > { %v200_v4 = vld [vmem:[%s191_s26] sm:$0xff]  ;;  %v201_v5 = vld [vmem:[%s191_s26 + $0x8] sm:$0xff]  ;;  %v202_v6 = vld [vmem:[%s191_s26 + $0x10] sm:$0xff]  ;;  %s832_s20 = sshll.u32 %s1141_s16, 9  ;;  %p841_p4 = scmp.ne.s32.totalorder %s1141_s16, 0 }
  0x11   : > { %v203_v7 = vld [vmem:[%s191_s26 + $0x18] sm:$0xff] }
  0x86   : > { %v207_v3 = vpop.permute.xlu0 %206 }
  0x87   : > { %v209_v8 = vmul.f32 %v207_v3, %v200_v4  ;;  %v210_v9 = vmul.f32 %v207_v3, %v201_v5  ;;  %v211_v10 = vmul.f32 %v207_v3, %v202_v6  ;;  %v212_v11 = vmul.f32 %v207_v3, %v203_v7 }
  0x8b   : > { %v215_v12 = vpop.permute.xlu0 %214 }
  0x8c   : > { %v217_v13 = vadd.f32 %v215_v12, %v209_v8  ;;  %v1157_v14 = vadd.f32 %v215_v12, %v210_v9  ;;  %v1159_v15 = vadd.f32 %v215_v12, %v211_v10  ;;  %v220_v16 = vadd.f32 %v215_v12, %v212_v11 }
  0x8e   : > { %v222_v17 = vmax.f32 %v1157_v14, 0.0  ;;  %v223_v18 = vmax.f32 %v1159_v15, 0.0  ;;  %v1163_v19 = vmax.f32 %v217_v13, 0.0  ;;  %v1165_v20 = vmax.f32 %v220_v16, 0.0 }
  0x90   : > { %v953_v21 = vpack.i.bf16 %v223_v18, %v222_v17  ;;  %v963_v22 = vpack.i.bf16 %v1165_v20, %v1163_v19 }
  0x92   : > { %954 = vrot.lane.b32.xlu0 %v953_v21, %s1093_s27  ;;  %939 = vrot.lane.b32.xlu1 %v953_v21, %s1094_s28 }
  0x96   : > { %964 = vrot.lane.b32.xlu0 %v963_v22, %s1093_s27  ;;  %944 = vrot.lane.b32.xlu1 %v963_v22, %s1094_s28 }
  0x9a   : > { %974 = vrot.lane.b32.xlu0 %v953_v21, %s1095_s29  ;;  %949 = vrot.lane.b32.xlu1 %v953_v21, %s1096_s30 }
  0x9e   : > { %984 = vrot.lane.b32.xlu0 %v963_v22, %s1095_s29  ;;  %959 = vrot.lane.b32.xlu1 %v963_v22, %s1096_s30 }
  0xa2   : > { %994 = vrot.lane.b32.xlu0 %v953_v21, %s1097_s5  ;;  %969 = vrot.lane.b32.xlu1 %v953_v21, %s1098_s6 }
  0xa6   : > { %1004 = vrot.lane.b32.xlu0 %v963_v22, %s1097_s5  ;;  %979 = vrot.lane.b32.xlu1 %v963_v22, %s1098_s6 }
  0xaa   : > { %1014 = vrot.lane.b32.xlu0 %v953_v21, %s1099_s7  ;;  %989 = vrot.lane.b32.xlu1 %v953_v21, %s1100_s8 }
  0xae   : > { %1024 = vrot.lane.b32.xlu0 %v963_v22, %s1099_s7  ;;  %999 = vrot.lane.b32.xlu1 %v963_v22, %s1100_s8 }
  0xb2   : > { %1034 = vrot.lane.b32.xlu0 %v953_v21, %s1101_s9  ;;  %1009 = vrot.lane.b32.xlu1 %v953_v21, %s1102_s10 }
  0xb6   : > { %1044 = vrot.lane.b32.xlu0 %v963_v22, %s1101_s9  ;;  %1019 = vrot.lane.b32.xlu1 %v963_v22, %s1102_s10 }
  0xba   : > { %1054 = vrot.lane.b32.xlu0 %v953_v21, %s1103_s11  ;;  %1029 = vrot.lane.b32.xlu1 %v953_v21, %s1104_s12 }
  0xbe   : > { %1064 = vrot.lane.b32.xlu0 %v963_v22, %s1103_s11  ;;  %1039 = vrot.lane.b32.xlu1 %v963_v22, %s1104_s12 }
  0xc2   : > { %1074 = vrot.lane.b32.xlu0 %v953_v21, %s1105_s13  ;;  %1049 = vrot.lane.b32.xlu1 %v953_v21, %s1106_s14 }
  0xc6   : > { %481 = vrot.lane.b32.xlu0 %v1163_v19, %s1105_s13  ;;  %1059 = vrot.lane.b32.xlu1 %v963_v22, %s1106_s14 }
  0xca   : > { %1069 = vrot.lane.b32.xlu1 %v953_v21, %s1108_s17 }
  0xce   : > { %1079 = vrot.lane.b32.xlu1 %v963_v22, %s1108_s17 }
  0xd2   : > { %487 = vrot.lane.b32.xlu1 %v1165_v20, %s1105_s13 }
 0x104   : > { %v955_v24 = vpop.permute.xlu0 %954  ;;  %v940_v25 = vpop.permute.xlu1 %939 }
 0x105   : > { %v942_v26 = vunpack.i.h.bf16 %v940_v25  ;;  %v941_v27 = vunpack.i.l.bf16 %v940_v25  ;;  %v957_v34 = vunpack.i.h.bf16 %v955_v24  ;;  %v956_v35 = vunpack.i.l.bf16 %v955_v24 }
 0x107   : > { %v239_v28 = vsel %vm237_vm0, %v941_v27, %v942_v26  ;;  %v275_v49 = vsel %vm273_vm1, %v956_v35, %v957_v34 }
 0x108   : > { %v965_v29 = vpop.permute.xlu0 %964  ;;  %v945_v30 = vpop.permute.xlu1 %944  ;;  %v845_v31 = vpack.c.bf16 %v239_v28, %v222_v17 }
 0x109   : > { %v947_v32 = vunpack.i.h.bf16 %v945_v30  ;;  %v946_v33 = vunpack.i.l.bf16 %v945_v30  ;;  %v967_v46 = vunpack.i.h.bf16 %v965_v29  ;;  %v966_v47 = vunpack.i.l.bf16 %v965_v29 }
 0x10a   : > { %846 = vmatprep.subr.bf16.mxu0 %v845_v31 }
 0x10b   : > { %v238_v36 = vsel %vm237_vm0, %v946_v33, %v941_v27  ;;  %v246_v37 = vsel %vm237_vm0, %v947_v32, %v946_v33  ;;  %v240_v38 = vsel %vm237_vm0, %v942_v26, %v947_v32  ;;  %v274_v57 = vsel %vm273_vm1, %v966_v47, %v956_v35 }
 0x10c   : > { %v975_v39 = vpop.permute.xlu0 %974  ;;  %v950_v40 = vpop.permute.xlu1 %949  ;;  %v847_v41 = vpack.c.bf16 %v238_v36, %v1163_v19  ;;  %v877_v42 = vpack.c.bf16 %v246_v37, %v1165_v20  ;;  %v879_v43 = vpack.c.bf16 %v240_v38, %v223_v18  ;;  %v282_v58 = vsel %vm273_vm1, %v967_v46, %v966_v47 }
 0x10d   : > { %v952_v44 = vunpack.i.h.bf16 %v950_v40  ;;  %v951_v45 = vunpack.i.l.bf16 %v950_v40  ;;  %v977_v55 = vunpack.i.h.bf16 %v975_v39  ;;  %v976_v56 = vunpack.i.l.bf16 %v975_v39 }
 0x10e   : > { %848 = vmatpush1.bf16.msra.mxu0 %v847_v41  ;;  %878 = vmatprep.subr.bf16.mxu1 %v877_v42  ;;  %v276_v62 = vsel %vm273_vm1, %v957_v34, %v967_v46 }
 0x10f   : > { %880 = vmatpush1.bf16.msra.mxu1 %v879_v43  ;;  %v257_v48 = vsel %vm255_vm2, %v951_v45, %v952_v44  ;;  %v311_v9 = vsel %vm309_vm3, %v976_v56, %v977_v55 }
 0x110   : > { %v985_v50 = vpop.permute.xlu0 %984  ;;  %v960_v51 = vpop.permute.xlu1 %959  ;;  %v849_v52 = vpack.c.bf16 %v275_v49, %v257_v48 }
 0x111   : > { %v962_v53 = vunpack.i.h.bf16 %v960_v51  ;;  %v961_v54 = vunpack.i.l.bf16 %v960_v51  ;;  %v987_v6 = vunpack.i.h.bf16 %v985_v50  ;;  %v986_v7 = vunpack.i.l.bf16 %v985_v50 }
 0x112   : > { %850 = vmatprep.subr.bf16.mxu0 %v849_v52 }
 0x113   : > { %v256_v59 = vsel %vm255_vm2, %v961_v54, %v951_v45  ;;  %v264_v60 = vsel %vm255_vm2, %v962_v53, %v961_v54  ;;  %v258_v61 = vsel %vm255_vm2, %v952_v44, %v962_v53  ;;  %v310_v17 = vsel %vm309_vm3, %v986_v7, %v976_v56 }
 0x114   : > { %v995_v63 = vpop.permute.xlu0 %994  ;;  %v970_v0 = vpop.permute.xlu1 %969  ;;  %v851_v1 = vpack.c.bf16 %v274_v57, %v256_v59  ;;  %v881_v2 = vpack.c.bf16 %v282_v58, %v264_v60  ;;  %v883_v3 = vpack.c.bf16 %v276_v62, %v258_v61  ;;  %v318_v18 = vsel %vm309_vm3, %v987_v6, %v986_v7 }
 0x115   : > { %v972_v4 = vunpack.i.h.bf16 %v970_v0  ;;  %v971_v5 = vunpack.i.l.bf16 %v970_v0  ;;  %v997_v15 = vunpack.i.h.bf16 %v995_v63  ;;  %v996_v16 = vunpack.i.l.bf16 %v995_v63 }
 0x116   : > { %852 = vmatpush1.bf16.msra.mxu0 %v851_v1  ;;  %882 = vmatprep.subr.bf16.mxu1 %v881_v2  ;;  %v312_v22 = vsel %vm309_vm3, %v977_v55, %v987_v6 }
 0x117   : > { %884 = vmatpush1.bf16.msra.mxu1 %v883_v3  ;;  %v293_v8 = vsel %vm291_vm4, %v971_v5, %v972_v4  ;;  %v347_v34 = vsel %vm345_vm5, %v996_v16, %v997_v15 }
 0x118   : > { %v1005_v10 = vpop.permute.xlu0 %1004  ;;  %v980_v11 = vpop.permute.xlu1 %979  ;;  %v853_v12 = vpack.c.bf16 %v311_v9, %v293_v8 }
 0x119   : > { %v982_v13 = vunpack.i.h.bf16 %v980_v11  ;;  %v981_v14 = vunpack.i.l.bf16 %v980_v11  ;;  %v1007_v31 = vunpack.i.h.bf16 %v1005_v10  ;;  %v1006_v32 = vunpack.i.l.bf16 %v1005_v10 }
 0x11a   : > { %854 = vmatprep.subr.bf16.mxu0 %v853_v12 }
 0x11b   : > { %v292_v19 = vsel %vm291_vm4, %v981_v14, %v971_v5  ;;  %v300_v20 = vsel %vm291_vm4, %v982_v13, %v981_v14  ;;  %v294_v21 = vsel %vm291_vm4, %v972_v4, %v982_v13  ;;  %v346_v42 = vsel %vm345_vm5, %v1006_v32, %v996_v16 }
 0x11c   : > { %v1015_v24 = vpop.permute.xlu0 %1014  ;;  %v990_v25 = vpop.permute.xlu1 %989  ;;  %v855_v26 = vpack.c.bf16 %v310_v17, %v292_v19  ;;  %v885_v27 = vpack.c.bf16 %v318_v18, %v300_v20  ;;  %v887_v28 = vpack.c.bf16 %v312_v22, %v294_v21  ;;  %v354_v43 = vsel %vm345_vm5, %v1007_v31, %v1006_v32 }
 0x11d   : > { %v992_v29 = vunpack.i.h.bf16 %v990_v25  ;;  %v991_v30 = vunpack.i.l.bf16 %v990_v25  ;;  %v1017_v40 = vunpack.i.h.bf16 %v1015_v24  ;;  %v1016_v41 = vunpack.i.l.bf16 %v1015_v24 }
 0x11e   : > { %856 = vmatpush1.bf16.msra.mxu0 %v855_v26  ;;  %886 = vmatprep.subr.bf16.mxu1 %v885_v27  ;;  %v348_v47 = vsel %vm345_vm5, %v997_v15, %v1007_v31 }
 0x11f   : > { %888 = vmatpush1.bf16.msra.mxu1 %v887_v28  ;;  %v329_v33 = vsel %vm327_vm6, %v991_v30, %v992_v29  ;;  %v383_v58 = vsel %vm381_vm7, %v1016_v41, %v1017_v40 }
 0x120   : > { %v1025_v35 = vpop.permute.xlu0 %1024  ;;  %v1000_v36 = vpop.permute.xlu1 %999  ;;  %v857_v37 = vpack.c.bf16 %v347_v34, %v329_v33 }
 0x121   : > { %v1002_v38 = vunpack.i.h.bf16 %v1000_v36  ;;  %v1001_v39 = vunpack.i.l.bf16 %v1000_v36  ;;  %v1027_v55 = vunpack.i.h.bf16 %v1025_v35  ;;  %v1026_v56 = vunpack.i.l.bf16 %v1025_v35 }
 0x122   : > { %858 = vmatprep.subr.bf16.mxu0 %v857_v37 }
 0x123   : > { %v328_v44 = vsel %vm327_vm6, %v1001_v39, %v991_v30  ;;  %v336_v45 = vsel %vm327_vm6, %v1002_v38, %v1001_v39  ;;  %v330_v46 = vsel %vm327_vm6, %v992_v29, %v1002_v38  ;;  %v382_v2 = vsel %vm381_vm7, %v1026_v56, %v1016_v41 }
 0x124   : > { %v1035_v48 = vpop.permute.xlu0 %1034  ;;  %v1010_v49 = vpop.permute.xlu1 %1009  ;;  %v859_v50 = vpack.c.bf16 %v346_v42, %v328_v44  ;;  %v889_v51 = vpack.c.bf16 %v354_v43, %v336_v45  ;;  %v891_v52 = vpack.c.bf16 %v348_v47, %v330_v46  ;;  %v390_v3 = vsel %vm381_vm7, %v1027_v55, %v1026_v56 }
 0x125   : > { %v1012_v53 = vunpack.i.h.bf16 %v1010_v49  ;;  %v1011_v54 = vunpack.i.l.bf16 %v1010_v49  ;;  %v1037_v0 = vunpack.i.h.bf16 %v1035_v48  ;;  %v1036_v1 = vunpack.i.l.bf16 %v1035_v48 }
 0x126   : > { %860 = vmatpush1.bf16.msra.mxu0 %v859_v50  ;;  %890 = vmatprep.subr.bf16.mxu1 %v889_v51  ;;  %v384_v7 = vsel %vm381_vm7, %v1017_v40, %v1027_v55 }
 0x127   : > { %892 = vmatpush1.bf16.msra.mxu1 %v891_v52  ;;  %v365_v57 = vsel %vm363_vm8, %v1011_v54, %v1012_v53  ;;  %v419_v18 = vsel %vm417_vm9, %v1036_v1, %v1037_v0 }
 0x128   : > { %v1045_v59 = vpop.permute.xlu0 %1044  ;;  %v1020_v60 = vpop.permute.xlu1 %1019  ;;  %v861_v61 = vpack.c.bf16 %v383_v58, %v365_v57 }
 0x129   : > { %v1022_v62 = vunpack.i.h.bf16 %v1020_v60  ;;  %v1021_v63 = vunpack.i.l.bf16 %v1020_v60  ;;  %v1047_v15 = vunpack.i.h.bf16 %v1045_v59  ;;  %v1046_v16 = vunpack.i.l.bf16 %v1045_v59 }
 0x12a   : > { %862 = vmatprep.subr.bf16.mxu0 %v861_v61 }
 0x12b   : > { %v364_v4 = vsel %vm363_vm8, %v1021_v63, %v1011_v54  ;;  %v372_v5 = vsel %vm363_vm8, %v1022_v62, %v1021_v63  ;;  %v366_v6 = vsel %vm363_vm8, %v1012_v53, %v1022_v62  ;;  %v418_v27 = vsel %vm417_vm9, %v1046_v16, %v1036_v1 }
 0x12c   : > { %v1055_v8 = vpop.permute.xlu0 %1054  ;;  %v1030_v9 = vpop.permute.xlu1 %1029  ;;  %v863_v10 = vpack.c.bf16 %v382_v2, %v364_v4  ;;  %v893_v11 = vpack.c.bf16 %v390_v3, %v372_v5  ;;  %v895_v12 = vpack.c.bf16 %v384_v7, %v366_v6  ;;  %v426_v28 = vsel %vm417_vm9, %v1047_v15, %v1046_v16 }
 0x12d   : > { %v1032_v13 = vunpack.i.h.bf16 %v1030_v9  ;;  %v1031_v14 = vunpack.i.l.bf16 %v1030_v9  ;;  %v1057_v25 = vunpack.i.h.bf16 %v1055_v8  ;;  %v1056_v26 = vunpack.i.l.bf16 %v1055_v8 }
 0x12e   : > { %864 = vmatpush1.bf16.msra.mxu0 %v863_v10  ;;  %894 = vmatprep.subr.bf16.mxu1 %v893_v11  ;;  %v420_v32 = vsel %vm417_vm9, %v1037_v0, %v1047_v15  ;;  %v499_v15 = vld [vmem:[%s1261_s2] sm:$0xff]  ;;  %v643_v16 = vlaneseq }
 0x12f   : > { %896 = vmatpush1.bf16.msra.mxu1 %v895_v12  ;;  %v401_v17 = vsel %vm399_vm10, %v1031_v14, %v1032_v13  ;;  %v455_v43 = vsel %vm453_vm11, %v1056_v26, %v1057_v25 }
 0x130   : > { %v1040_v19 = vpop.permute.xlu1 %1039  ;;  %v865_v20 = vpack.c.bf16 %v419_v18, %v401_v17  ;;  %v1065_v21 = vpop.permute.xlu0 %1064  ;;  %v644_v17 = vand.u32 127, %v643_v16  ;;  %v648_v18 = vstv %s832_s20 }
 0x131   : > { %v1042_v22 = vunpack.i.h.bf16 %v1040_v19  ;;  %v1041_v24 = vunpack.i.l.bf16 %v1040_v19  ;;  %v1067_v39 = vunpack.i.h.bf16 %v1065_v21  ;;  %v1066_v40 = vunpack.i.l.bf16 %v1065_v21 }
 0x132   : > { %866 = vmatprep.subr.bf16.mxu0 %v865_v20  ;;  %v645_v19 = vadd.s32 128, %v644_v17  ;;  %v646_v20 = vadd.s32 256, %v644_v17  ;;  %v649_v21 = vadd.s32 %v648_v18, %v644_v17 }
 0x133   : > { %v400_v29 = vsel %vm399_vm10, %v1041_v24, %v1031_v14  ;;  %v408_v30 = vsel %vm399_vm10, %v1042_v22, %v1041_v24  ;;  %v402_v31 = vsel %vm399_vm10, %v1032_v13, %v1042_v22  ;;  %v454_v50 = vsel %vm453_vm11, %v1066_v40, %v1056_v26 }
 0x134   : > { %v1050_v33 = vpop.permute.xlu1 %1049  ;;  %v867_v34 = vpack.c.bf16 %v418_v27, %v400_v29  ;;  %v897_v35 = vpack.c.bf16 %v426_v28, %v408_v30  ;;  %v899_v36 = vpack.c.bf16 %v420_v32, %v402_v31  ;;  %v1075_v41 = vpop.permute.xlu0 %1074  ;;  %v462_v51 = vsel %vm453_vm11, %v1067_v39, %v1066_v40 }
 0x135   : > { %v1052_v37 = vunpack.i.h.bf16 %v1050_v33  ;;  %v1051_v38 = vunpack.i.l.bf16 %v1050_v33  ;;  %v1077_v48 = vunpack.i.h.bf16 %v1075_v41  ;;  %v1076_v49 = vunpack.i.l.bf16 %v1075_v41 }
 0x136   : > { %868 = vmatpush1.bf16.msra.mxu0 %v867_v34  ;;  %898 = vmatprep.subr.bf16.mxu1 %v897_v35  ;;  %v456_v55 = vsel %vm453_vm11, %v1057_v25, %v1067_v39  ;;  %v647_v22 = vadd.s32 384, %v644_v17  ;;  %v650_v24 = vadd.s32 %v648_v18, %v645_v19  ;;  %v651_v25 = vadd.s32 %v648_v18, %v646_v20 }
 0x137   : > { %900 = vmatpush1.bf16.msra.mxu1 %v899_v36  ;;  %v437_v42 = vsel %vm435_vm12, %v1051_v38, %v1052_v37  ;;  %v491_v63 = vsel %vm489_vm13, %v1076_v49, %v1077_v48  ;;  %v658_v26 = vsub.s32 0, %v649_v21  ;;  %vm657_vm15 = vcmp.lt.s32.totalorder %v649_v21, 0 }
 0x138   : > { %v1060_v44 = vpop.permute.xlu1 %1059  ;;  %v869_v45 = vpack.c.bf16 %v455_v43, %v437_v42  ;;  %v482_v0 = vpop.permute.xlu0 %481  ;;  %v652_v27 = vadd.s32 %v648_v18, %v647_v22  ;;  %v665_v28 = vsub.s32 0, %v650_v24  ;;  %v672_v29 = vsub.s32 0, %v651_v25 }
 0x139   : > { %v1062_v46 = vunpack.i.h.bf16 %v1060_v44  ;;  %v1061_v47 = vunpack.i.l.bf16 %v1060_v44  ;;  %v490_v5 = vsel %vm489_vm13, %v482_v0, %v1076_v49  ;;  %v833_v30 = vmin.u32 %v658_v26, %v649_v21 }
 0x13a   : > { %870 = vmatprep.subr.bf16.mxu0 %v869_v45  ;;  %v679_v31 = vsub.s32 0, %v652_v27  ;;  %v834_v32 = vmin.u32 %v665_v28, %v650_v24  ;;  %v835_v33 = vmin.u32 %v672_v29, %v651_v25  ;;  %vm664_vm0 = vcmp.lt.s32.totalorder %v650_v24, 0 }
 0x13b   : > { %v436_v52 = vsel %vm435_vm12, %v1061_v47, %v1051_v38  ;;  %v444_v53 = vsel %vm435_vm12, %v1062_v46, %v1061_v47  ;;  %v438_v54 = vsel %vm435_vm12, %v1052_v37, %v1062_v46  ;;  %v661_v34 = vand.u32 63, %v833_v30 }
 0x13c   : > { %v1070_v56 = vpop.permute.xlu1 %1069  ;;  %v871_v57 = vpack.c.bf16 %v454_v50, %v436_v52  ;;  %v901_v58 = vpack.c.bf16 %v462_v51, %v444_v53  ;;  %v903_v59 = vpack.c.bf16 %v456_v55, %v438_v54  ;;  %v836_v35 = vmin.u32 %v679_v31, %v652_v27 }
 0x13d   : > { %v1072_v60 = vunpack.i.h.bf16 %v1070_v56  ;;  %v1071_v61 = vunpack.i.l.bf16 %v1070_v56  ;;  %v668_v36 = vand.u32 63, %v834_v32  ;;  %v675_v37 = vand.u32 63, %v835_v33 }
 0x13e   : > { %872 = vmatpush1.bf16.msra.mxu0 %v871_v57  ;;  %902 = vmatprep.subr.bf16.mxu1 %v901_v58  ;;  %v662_v38 = vsub.s32 0, %v661_v34  ;;  %v682_v39 = vand.u32 63, %v836_v35  ;;  %vm671_vm1 = vcmp.lt.s32.totalorder %v651_v25, 0  ;;  %vm678_vm2 = vcmp.lt.s32.totalorder %v652_v27, 0 }
 0x13f   : > { %904 = vmatpush1.bf16.msra.mxu1 %v903_v59  ;;  %v473_v62 = vsel %vm471_vm14, %v1071_v61, %v1072_v60  ;;  %v669_v40 = vsub.s32 0, %v668_v36  ;;  %v676_v41 = vsub.s32 0, %v675_v37 }
 0x140   : > { %v1080_v1 = vpop.permute.xlu1 %1079  ;;  %v873_v2 = vpack.c.bf16 %v491_v63, %v473_v62  ;;  %v663_v42 = vsel %vm657_vm15, %v662_v38, %v661_v34  ;;  %v683_v43 = vsub.s32 0, %v682_v39  ;;  %vm653_vm15 = vcmp.lt.s32.totalorder %v649_v21, 1024 }
 0x141   : > { %v1082_v3 = vunpack.i.h.bf16 %v1080_v1  ;;  %v1081_v4 = vunpack.i.l.bf16 %v1080_v1  ;;  %v670_v44 = vsel %vm664_vm0, %v669_v40, %v668_v36  ;;  %vm685_vm3 = vcmp.ne.s32.totalorder %v663_v42, 0 }
 0x142   : > { %874 = vmatprep.subr.bf16.mxu0 %v873_v2  ;;  %vm689_vm4 = vcmp.lt.s32.totalorder %v663_v42, 0  ;;  %v677_v45 = vsel %vm671_vm1, %v676_v41, %v675_v37  ;;  %vm686_vm5 = vcmp.ne.s32.totalorder %v670_v44, 0  ;;  %vm690_vm6 = vcmp.lt.s32.totalorder %v670_v44, 0 }
 0x143   : > { %v472_v6 = vsel %vm471_vm14, %v1081_v4, %v1071_v61  ;;  %v474_v9 = vsel %vm471_vm14, %v1072_v60, %v1082_v3  ;;  %v480_v10 = vsel %vm471_vm14, %v1082_v3, %v1081_v4  ;;  %v684_v46 = vsel %vm678_vm2, %v683_v43, %v682_v39  ;;  %vm693_vm7 = vmand %vm689_vm4, %vm685_vm3 }
 0x144   : > { %v488_v7 = vpop.permute.xlu1 %487  ;;  %v875_v8 = vpack.c.bf16 %v490_v5, %v472_v6  ;;  %v697_v47 = vadd.s32 64, %v663_v42  ;;  %vm687_vm8 = vcmp.ne.s32.totalorder %v677_v45, 0  ;;  %vm691_vm9 = vcmp.lt.s32.totalorder %v677_v45, 0  ;;  %vm694_vm10 = vmand %vm690_vm6, %vm686_vm5 }
 0x145   : > { %v492_v11 = vsel %vm489_vm13, %v1077_v48, %v488_v7  ;;  %v498_v12 = vsel %vm489_vm13, %v488_v7, %v482_v0  ;;  %v698_v48 = vadd.s32 64, %v670_v44  ;;  %vm688_vm11 = vcmp.ne.s32.totalorder %v684_v46, 0  ;;  %vm695_vm13 = vmand %vm691_vm9, %vm687_vm8 }
 0x146   : > { %v905_v13 = vpack.c.bf16 %v498_v12, %v480_v10  ;;  %v907_v14 = vpack.c.bf16 %v492_v11, %v474_v9  ;;  %876 = vmatpush1.bf16.msra.mxu0 %v875_v8  ;;  %vm692_vm12 = vcmp.lt.s32.totalorder %v684_v46, 0  ;;  %v699_v49 = vadd.s32 64, %v677_v45 }
 0x147   : > { %v701_v50 = vsel %vm693_vm7, %v697_v47, %v663_v42  ;;  %v700_v51 = vadd.s32 64, %v684_v46  ;;  %v702_v52 = vsel %vm694_vm10, %v698_v48, %v670_v44  ;;  %vm696_vm14 = vmand %vm692_vm12, %vm688_vm11  ;;  %vm654_vm1 = vcmp.lt.s32.totalorder %v650_v24, 1024 }
 0x148   : > { %906 = vmatprep.subr.bf16.mxu1 %v905_v13  ;;  %vm705_vm0 = vcmp.lt.s32.totalorder %v701_v50, 34  ;;  %v703_v53 = vsel %vm695_vm13, %v699_v49, %v677_v45  ;;  %vm706_vm2 = vcmp.lt.s32.totalorder %v702_v52, 34  ;;  %vm655_vm4 = vcmp.lt.s32.totalorder %v651_v25, 1024 }
 0x149   : > { %565 = vmatmul.mubr.f32.vlgmr.msra.gmra.mrb[0].mxu0 %v499_v15  ;;  %908 = vmatpush1.bf16.msra.mxu1 %v907_v14  ;;  %v704_v54 = vsel %vm696_vm14, %v700_v51, %v684_v46  ;;  %vm709_vm3 = vmand %vm653_vm15, %vm705_vm0  ;;  %vm707_vm5 = vcmp.lt.s32.totalorder %v703_v53, 34  ;;  %vm656_vm7 = vcmp.lt.s32.totalorder %v652_v27, 1024  ;;  %vm739_vm11 = vcmask 7168  }
 0x14a   : > { %vm710_vm6 = vmand %vm654_vm1, %vm706_vm2  ;;  %vm708_vm8 = vcmp.lt.s32.totalorder %v704_v54, 34  ;;  %v837_v55 = vsel %vm709_vm3, 1.0, %v1107_v23  ;;  %vm745_vm12 = vcmask (!%p841_p4), 15360  }
 0x14b   : > { %vm711_vm9 = vmand %vm655_vm4, %vm707_vm5  ;;  %v838_v56 = vsel %vm710_vm6, 1.0, %v1107_v23 }
 0x14c   : > { %636 = vmatmul.mubr.f32.vlgmr.msra.gmra.mrb[0].mxu1 %v499_v15  ;;  %vm712_vm10 = vmand %vm656_vm7, %vm708_vm8  ;;  %v839_v60 = vsel %vm711_vm9, 1.0, %v1107_v23  ;;  %v1109_v15 = vmov (!%p841_p4), 0.0  }
 0x14d   : > { %v840_v62 = vsel %vm712_vm10, 1.0, %v1107_v23  ;;  %746 = vst.msk [vmem:[#allocation2] sm:$0xff] (!%p841_p4), %vm745_vm12, %v1109_v15 }
 0x21c   : > { %v566_v57 = vpop.f32.mrb[0].mxu0 }
 0x21d   : > { %v721_v58 = vmul.f32 %v837_v55, %v566_v57  ;;  %v568_v59 = vpop.f32.mrb[1].mxu0 }
 0x21e   : > { %v722_v61 = vmul.f32 %v838_v56, %v568_v59 }
 0x21f   : > { %v730_v63 = vmul.f32 %v721_v58, %v566_v57  ;;  %v637_v0 = vpop.f32.mrb[0].mxu1 }
 0x220   : > { %v725_v1 = vadd.f32 %v722_v61, %v721_v58  ;;  %v731_v2 = vmul.f32 %v722_v61, %v568_v59  ;;  %v723_v3 = vmul.f32 %v839_v60, %v637_v0  ;;  %v639_v4 = vpop.f32.mrb[1].mxu1 }
 0x221   : > { %v724_v5 = vmul.f32 %v840_v62, %v639_v4 }
 0x222   : > { %v734_v6 = vadd.f32 %v731_v2, %v730_v63  ;;  %v732_v7 = vmul.f32 %v723_v3, %v637_v0  ;;  %v726_v8 = vadd.f32 %v725_v1, %v723_v3 }
 0x223   : > { %v733_v9 = vmul.f32 %v724_v5, %v639_v4 }
 0x224   : > { %v727_v10 = vadd.f32 %v726_v8, %v724_v5  ;;  %v735_v11 = vadd.f32 %v734_v6, %v732_v7 }
 0x226   : > { %728 = vadd.xlane.f32.xlu0 %v727_v10  ;;  %v736_v12 = vadd.f32 %v735_v11, %v733_v9 }
 0x228   : > { %737 = vadd.xlane.f32.xlu1 %v736_v12 }
 0x2b0   : > { %744 = sbr.rel (%p841_p4) target bundleno = 695 (0x2b7), region = 36 }
 0x2b3   : > { %v729_v13 = vpop.xlane.xlu0 %728 }
 0x2b5   : > { %v738_v14 = vpop.xlane.xlu1 %737 }
 0x2b6   : > { %v740_v23 = vsel %vm739_vm11, %v729_v13, %v738_v14 }
 0x2b7 PF: > { %v747_v16 = vld [vmem:[#allocation2] sm:$0xff]  ;;  %vm749_vm13 = vcmask 15360   ;;  %p842_p5 = scmp.ne.s32.totalorder %s1141_s16, 1 }
 0x2b8   : > { %v748_v17 = vadd.f32 %v747_v16, %v740_v23 }
 0x2b9   : > { %754 = sbr.rel (%p842_p5) target bundleno = 707 (0x2c3), region = 40 }
 0x2ba   : > { %750 = vst.msk [vmem:[#allocation2] sm:$0xff] %vm749_vm13, %v748_v17 }
 0x2c1   : > { %v755_v18 = vld [vmem:[#allocation2] sm:$0xff] }
 0x2c2   : > { %756 = vst.msk [vmem:[%s1263_s4] sm:$0xff] %vm749_vm13, %v755_v18 }
 0x2c3 PF: > { %757 = vst [vmem:[%s1152_s23] sm:$0xff] %v566_v57  ;;  %758 = vst [vmem:[%s1152_s23 + $0x8] sm:$0xff] %v568_v59 }
 0x2c4   : > { %759 = vst [vmem:[%s1152_s23 + $0x10] sm:$0xff] %v637_v0  ;;  %760 = vst [vmem:[%s1152_s23 + $0x18] sm:$0xff] %v639_v4 }
 0x2c5 PF: > { %s15_s15 = sadd.s32 1, %s1089_s15  }
 0x2c6   : > { %p12_p6 = scmp.ge.s32.totalorder %s15_s15, 4  }
 0x2c8   :  { %14 = sbr.rel (!%p12_p6) target bundleno = 1 (0x1), region = 78 }

// kernel: residual_forward.3
= control target key start
LH: loop header
LB: loop body
LE: loop exit
PB: predicated region body
PF: predicated region fallthrough
CT: control target
= control target key end

     0   :  { %s1075_s12 = smov 0   ;;  %s1194_s0 = inlined_call_operand.vmem [shape: f32[8,1024], index: 0, kind: input, shape index: {}]   ;;  %s1195_s1 = inlined_call_operand.vmem [shape: f32[8,128], index: 1, kind: input, shape index: {}]   ;;  %s1196_s2 = inlined_call_operand.vmem [shape: f32[8,1024], index: 2, kind: output, shape index: {0}]   ;;  %s1197_s3 = inlined_call_operand.vmem [shape: f32[8,2], index: 3, kind: output, shape index: {1}]  }
   0x1 LB: > { %s1081_s13 = sadd.s32 4294967295, %s1036_s12   ;;  %p778_p0 = scmp.ge.s32.totalorder %s1036_s12, 1  ;;  %s1036_s12 = sphi %s1075_s12, %s14_s12  }
   0x2   : > { %p136_p1 = scmp.lt.s32.totalorder %s1036_s12, 3 }
   0x4   : > { %p137_p2 = pnand %p778_p0, %p136_p1 }
   0x5   : > { %s779_s14 = sshll.u32 (!%p137_p2), %s1081_s13, 2  ;;  %s1038_s22 = smov (!%p137_p2), 126   ;;  %v1051_v6 = vmov (!%p137_p2), 0.0   ;;  %vm188_vm0 = vcmask (!%p137_p2), 1039360   ;;  %vm206_vm1 = vcmask (!%p137_p2), 1031168   ;;  %vm224_vm2 = vcmask (!%p137_p2), 1022976  }
   0x6   : > { %140 = sbr.rel (%p137_p2) target bundleno = 578 (0x242), region = 28  ;;  %p161_p3 = scmp.lt.s32.totalorder (!%p137_p2), %s779_s14, 7  ;;  %515 = vmatprep.mubr.f32.mxu0 (!%p137_p2), %v1051_v6  ;;  %586 = vmatprep.mubr.f32.mxu1 (!%p137_p2), %v1051_v6  ;;  %vm242_vm3 = vcmask (!%p137_p2), 1014784   ;;  %vm260_vm4 = vcmask (!%p137_p2), 1006592   ;;  %vm278_vm5 = vcmask (!%p137_p2), 998400   ;;  %vm296_vm6 = vcmask (!%p137_p2), 990208  }
   0x7   : > { %s1039_s23 = smov (!%p137_p2), 127   ;;  %s1040_s24 = smov (!%p137_p2), 125   ;;  %vm314_vm7 = vcmask (!%p137_p2), 982016   ;;  %vm332_vm8 = vcmask (!%p137_p2), 973824   ;;  %vm350_vm9 = vcmask (!%p137_p2), 965632   ;;  %vm368_vm10 = vcmask (!%p137_p2), 957440  }
   0x8   : > { %s1041_s25 = smov (!%p137_p2), 123   ;;  %s1042_s26 = smov (!%p137_p2), 124   ;;  %vm386_vm11 = vcmask (!%p137_p2), 949248   ;;  %vm404_vm12 = vcmask (!%p137_p2), 941056   ;;  %vm440_vm13 = vcmask (!%p137_p2), 924672   ;;  %vm422_vm14 = vcmask (!%p137_p2), 932864  }
   0x9   : > { %s1043_s27 = smov (!%p137_p2), 121   ;;  %s1044_s28 = smov (!%p137_p2), 122  }
   0xa   : > { %s1045_s29 = smov (!%p137_p2), 119   ;;  %s1046_s30 = smov (!%p137_p2), 120  }
   0xb   : > { %s1047_s4 = smov (!%p137_p2), 117   ;;  %s1048_s5 = smov (!%p137_p2), 118  }
   0xc   : > { %s1049_s6 = smov (!%p137_p2), 115   ;;  %s1050_s7 = smov (!%p137_p2), 116  }
   0xd   : > { %s1199_s14 = smov (!%p161_p3, %s779_s14), 7  ;;  %s1052_s8 = smov 113  }
   0xe   : > { %s780_s15 = sshll.u32 %s1199_s14, 3  ;;  %s1053_s9 = smov 114  }
   0xf   : > { %s164_s18 = scalar_lea.vmem %s1194_s0, %s780_s15  ;;  %s1092_s21 = scalar_lea.vmem %s1196_s2, %s780_s15 }
  0x10   : > { %v1094_v0 = vld [vmem:[%s164_s18 + $0x8] sm:$0xff]  ;;  %v1096_v1 = vld [vmem:[%s164_s18 + $0x10] sm:$0xff]  ;;  %v1098_v2 = vld [vmem:[%s164_s18] sm:$0xff]  ;;  %s783_s14 = sshll.u32 %s1081_s13, 9  ;;  %p792_p4 = scmp.ne.s32.totalorder %s1081_s13, 0 }
  0x11   : > { %v895_v3 = vpack.i.bf16 %v1096_v1, %v1094_v0  ;;  %v1102_v4 = vld [vmem:[%s164_s18 + $0x18] sm:$0xff] }
  0x12   : > { %v890_v5 = vpack.i.bf16 %v1102_v4, %v1098_v2 }
  0x13   : > { %896 = vrot.lane.b32.xlu1 %v895_v3, %s1038_s22  ;;  %886 = vrot.lane.b32.xlu0 %v895_v3, %s1039_s23 }
  0x17   : > { %901 = vrot.lane.b32.xlu1 %v895_v3, %s1040_s24  ;;  %891 = vrot.lane.b32.xlu0 %v890_v5, %s1039_s23 }
  0x1b   : > { %911 = vrot.lane.b32.xlu1 %v890_v5, %s1040_s24  ;;  %906 = vrot.lane.b32.xlu0 %v890_v5, %s1038_s22 }
  0x1f   : > { %921 = vrot.lane.b32.xlu1 %v895_v3, %s1041_s25  ;;  %916 = vrot.lane.b32.xlu0 %v895_v3, %s1042_s26 }
  0x23   : > { %931 = vrot.lane.b32.xlu1 %v890_v5, %s1041_s25  ;;  %926 = vrot.lane.b32.xlu0 %v890_v5, %s1042_s26 }
  0x27   : > { %941 = vrot.lane.b32.xlu1 %v895_v3, %s1043_s27  ;;  %936 = vrot.lane.b32.xlu0 %v895_v3, %s1044_s28 }
  0x2b   : > { %951 = vrot.lane.b32.xlu1 %v890_v5, %s1043_s27  ;;  %946 = vrot.lane.b32.xlu0 %v890_v5, %s1044_s28 }
  0x2f   : > { %961 = vrot.lane.b32.xlu1 %v895_v3, %s1045_s29  ;;  %956 = vrot.lane.b32.xlu0 %v895_v3, %s1046_s30 }
  0x33   : > { %971 = vrot.lane.b32.xlu1 %v890_v5, %s1045_s29  ;;  %966 = vrot.lane.b32.xlu0 %v890_v5, %s1046_s30 }
  0x37   : > { %981 = vrot.lane.b32.xlu1 %v895_v3, %s1047_s4  ;;  %976 = vrot.lane.b32.xlu0 %v895_v3, %s1048_s5 }
  0x3b   : > { %991 = vrot.lane.b32.xlu1 %v890_v5, %s1047_s4  ;;  %986 = vrot.lane.b32.xlu0 %v890_v5, %s1048_s5 }
  0x3f   : > { %1001 = vrot.lane.b32.xlu1 %v895_v3, %s1049_s6  ;;  %996 = vrot.lane.b32.xlu0 %v895_v3, %s1050_s7 }
  0x43   : > { %1011 = vrot.lane.b32.xlu1 %v890_v5, %s1049_s6  ;;  %1006 = vrot.lane.b32.xlu0 %v890_v5, %s1050_s7 }
  0x47   : > { %1021 = vrot.lane.b32.xlu1 %v895_v3, %s1052_s8  ;;  %1016 = vrot.lane.b32.xlu0 %v895_v3, %s1053_s9 }
  0x4b   : > { %432 = vrot.lane.b32.xlu1 %v1098_v2, %s1052_s8  ;;  %1026 = vrot.lane.b32.xlu0 %v890_v5, %s1053_s9 }
  0x4f   : > { %438 = vrot.lane.b32.xlu0 %v1102_v4, %s1052_s8 }
  0x85   : > { %v897_v7 = vpop.permute.xlu1 %896  ;;  %v887_v8 = vpop.permute.xlu0 %886 }
  0x86   : > { %v889_v9 = vunpack.i.h.bf16 %v887_v8  ;;  %v888_v10 = vunpack.i.l.bf16 %v887_v8  ;;  %v899_v11 = vunpack.i.h.bf16 %v897_v7  ;;  %v898_v12 = vunpack.i.l.bf16 %v897_v7 }
  0x88   : > { %v190_v13 = vsel %vm188_vm0, %v888_v10, %v889_v9  ;;  %v208_v21 = vsel %vm206_vm1, %v898_v12, %v899_v11 }
  0x89   : > { %v902_v14 = vpop.permute.xlu1 %901  ;;  %v892_v15 = vpop.permute.xlu0 %891  ;;  %v796_v16 = vpack.c.bf16 %v190_v13, %v1094_v0 }
  0x8a   : > { %v904_v17 = vunpack.i.h.bf16 %v902_v14  ;;  %v903_v18 = vunpack.i.l.bf16 %v902_v14  ;;  %v894_v19 = vunpack.i.h.bf16 %v892_v15  ;;  %v893_v20 = vunpack.i.l.bf16 %v892_v15 }
  0x8b   : > { %797 = vmatprep.subr.bf16.mxu0 %v796_v16 }
  0x8c   : > { %v189_v22 = vsel %vm188_vm0, %v893_v20, %v888_v10  ;;  %v197_v23 = vsel %vm188_vm0, %v894_v19, %v893_v20  ;;  %v226_v24 = vsel %vm224_vm2, %v903_v18, %v904_v17  ;;  %v191_v25 = vsel %vm188_vm0, %v889_v9, %v894_v19 }
  0x8d   : > { %v912_v26 = vpop.permute.xlu1 %911  ;;  %v907_v27 = vpop.permute.xlu0 %906  ;;  %v798_v28 = vpack.c.bf16 %v189_v22, %v1098_v2  ;;  %v828_v29 = vpack.c.bf16 %v197_v23, %v1102_v4  ;;  %v800_v30 = vpack.c.bf16 %v226_v24, %v208_v21  ;;  %v830_v31 = vpack.c.bf16 %v191_v25, %v1096_v1 }
  0x8e   : > { %v914_v32 = vunpack.i.h.bf16 %v912_v26  ;;  %v913_v33 = vunpack.i.l.bf16 %v912_v26  ;;  %v909_v34 = vunpack.i.h.bf16 %v907_v27  ;;  %v908_v35 = vunpack.i.l.bf16 %v907_v27 }
  0x8f   : > { %799 = vmatpush1.bf16.msra.mxu0 %v798_v28  ;;  %829 = vmatprep.subr.bf16.mxu1 %v828_v29 }
  0x90   : > { %801 = vmatprep.subr.bf16.mxu0 %v800_v30  ;;  %831 = vmatpush1.bf16.msra.mxu1 %v830_v31  ;;  %v207_v36 = vsel %vm206_vm1, %v908_v35, %v898_v12  ;;  %v225_v37 = vsel %vm224_vm2, %v913_v33, %v903_v18  ;;  %v215_v38 = vsel %vm206_vm1, %v909_v34, %v908_v35 }
  0x91   : > { %v922_v39 = vpop.permute.xlu1 %921  ;;  %v917_v40 = vpop.permute.xlu0 %916  ;;  %v802_v41 = vpack.c.bf16 %v225_v37, %v207_v36  ;;  %v233_v42 = vsel %vm224_vm2, %v914_v32, %v913_v33  ;;  %v209_v43 = vsel %vm206_vm1, %v899_v11, %v909_v34  ;;  %v227_v44 = vsel %vm224_vm2, %v904_v17, %v914_v32 }
  0x92   : > { %v924_v45 = vunpack.i.h.bf16 %v922_v39  ;;  %v923_v46 = vunpack.i.l.bf16 %v922_v39  ;;  %v919_v47 = vunpack.i.h.bf16 %v917_v40  ;;  %v918_v48 = vunpack.i.l.bf16 %v917_v40 }
  0x93   : > { %803 = vmatpush1.bf16.msra.mxu0 %v802_v41  ;;  %v832_v49 = vpack.c.bf16 %v233_v42, %v215_v38  ;;  %v834_v50 = vpack.c.bf16 %v227_v44, %v209_v43 }
  0x94   : > { %v244_v51 = vsel %vm242_vm3, %v918_v48, %v919_v47  ;;  %v262_v52 = vsel %vm260_vm4, %v923_v46, %v924_v45 }
  0x95   : > { %833 = vmatprep.subr.bf16.mxu1 %v832_v49  ;;  %v932_v53 = vpop.permute.xlu1 %931  ;;  %v927_v54 = vpop.permute.xlu0 %926  ;;  %v804_v55 = vpack.c.bf16 %v262_v52, %v244_v51 }
  0x96   : > { %835 = vmatpush1.bf16.msra.mxu1 %v834_v50  ;;  %v934_v56 = vunpack.i.h.bf16 %v932_v53  ;;  %v933_v57 = vunpack.i.l.bf16 %v932_v53  ;;  %v929_v58 = vunpack.i.h.bf16 %v927_v54  ;;  %v928_v59 = vunpack.i.l.bf16 %v927_v54 }
  0x97   : > { %805 = vmatprep.subr.bf16.mxu0 %v804_v55 }
  0x98   : > { %v243_v60 = vsel %vm242_vm3, %v928_v59, %v918_v48  ;;  %v261_v61 = vsel %vm260_vm4, %v933_v57, %v923_v46  ;;  %v251_v62 = vsel %vm242_vm3, %v929_v58, %v928_v59  ;;  %v269_v63 = vsel %vm260_vm4, %v934_v56, %v933_v57 }
  0x99   : > { %v942_v0 = vpop.permute.xlu1 %941  ;;  %v937_v1 = vpop.permute.xlu0 %936  ;;  %v806_v2 = vpack.c.bf16 %v261_v61, %v243_v60  ;;  %v836_v3 = vpack.c.bf16 %v269_v63, %v251_v62  ;;  %v245_v4 = vsel %vm242_vm3, %v919_v47, %v929_v58  ;;  %v263_v5 = vsel %vm260_vm4, %v924_v45, %v934_v56 }
  0x9a   : > { %v944_v7 = vunpack.i.h.bf16 %v942_v0  ;;  %v943_v8 = vunpack.i.l.bf16 %v942_v0  ;;  %v939_v9 = vunpack.i.h.bf16 %v937_v1  ;;  %v938_v10 = vunpack.i.l.bf16 %v937_v1 }
  0x9b   : > { %807 = vmatpush1.bf16.msra.mxu0 %v806_v2  ;;  %837 = vmatprep.subr.bf16.mxu1 %v836_v3  ;;  %v838_v11 = vpack.c.bf16 %v263_v5, %v245_v4 }
  0x9c   : > { %v280_v12 = vsel %vm278_vm5, %v938_v10, %v939_v9  ;;  %v298_v13 = vsel %vm296_vm6, %v943_v8, %v944_v7 }
  0x9d   : > { %839 = vmatpush1.bf16.msra.mxu1 %v838_v11  ;;  %v952_v14 = vpop.permute.xlu1 %951  ;;  %v947_v15 = vpop.permute.xlu0 %946  ;;  %v808_v16 = vpack.c.bf16 %v298_v13, %v280_v12 }
  0x9e   : > { %v954_v17 = vunpack.i.h.bf16 %v952_v14  ;;  %v953_v18 = vunpack.i.l.bf16 %v952_v14  ;;  %v949_v19 = vunpack.i.h.bf16 %v947_v15  ;;  %v948_v20 = vunpack.i.l.bf16 %v947_v15 }
  0x9f   : > { %809 = vmatprep.subr.bf16.mxu0 %v808_v16 }
  0xa0   : > { %v279_v21 = vsel %vm278_vm5, %v948_v20, %v938_v10  ;;  %v297_v22 = vsel %vm296_vm6, %v953_v18, %v943_v8  ;;  %v287_v23 = vsel %vm278_vm5, %v949_v19, %v948_v20  ;;  %v305_v24 = vsel %vm296_vm6, %v954_v17, %v953_v18 }
  0xa1   : > { %v962_v25 = vpop.permute.xlu1 %961  ;;  %v957_v26 = vpop.permute.xlu0 %956  ;;  %v810_v27 = vpack.c.bf16 %v297_v22, %v279_v21  ;;  %v840_v28 = vpack.c.bf16 %v305_v24, %v287_v23  ;;  %v281_v29 = vsel %vm278_vm5, %v939_v9, %v949_v19  ;;  %v299_v30 = vsel %vm296_vm6, %v944_v7, %v954_v17 }
  0xa2   : > { %v964_v31 = vunpack.i.h.bf16 %v962_v25  ;;  %v963_v32 = vunpack.i.l.bf16 %v962_v25  ;;  %v959_v33 = vunpack.i.h.bf16 %v957_v26  ;;  %v958_v34 = vunpack.i.l.bf16 %v957_v26 }
  0xa3   : > { %811 = vmatpush1.bf16.msra.mxu0 %v810_v27  ;;  %841 = vmatprep.subr.bf16.mxu1 %v840_v28  ;;  %v842_v35 = vpack.c.bf16 %v299_v30, %v281_v29 }
  0xa4   : > { %v316_v36 = vsel %vm314_vm7, %v958_v34, %v959_v33  ;;  %v334_v37 = vsel %vm332_vm8, %v963_v32, %v964_v31 }
  0xa5   : > { %843 = vmatpush1.bf16.msra.mxu1 %v842_v35  ;;  %v972_v38 = vpop.permute.xlu1 %971  ;;  %v967_v39 = vpop.permute.xlu0 %966  ;;  %v812_v40 = vpack.c.bf16 %v334_v37, %v316_v36 }
  0xa6   : > { %v974_v41 = vunpack.i.h.bf16 %v972_v38  ;;  %v973_v42 = vunpack.i.l.bf16 %v972_v38  ;;  %v969_v43 = vunpack.i.h.bf16 %v967_v39  ;;  %v968_v44 = vunpack.i.l.bf16 %v967_v39 }
  0xa7   : > { %813 = vmatprep.subr.bf16.mxu0 %v812_v40 }
  0xa8   : > { %v315_v45 = vsel %vm314_vm7, %v968_v44, %v958_v34  ;;  %v333_v46 = vsel %vm332_vm8, %v973_v42, %v963_v32  ;;  %v323_v47 = vsel %vm314_vm7, %v969_v43, %v968_v44  ;;  %v341_v48 = vsel %vm332_vm8, %v974_v41, %v973_v42 }
  0xa9   : > { %v982_v49 = vpop.permute.xlu1 %981  ;;  %v977_v50 = vpop.permute.xlu0 %976  ;;  %v814_v51 = vpack.c.bf16 %v333_v46, %v315_v45  ;;  %v844_v52 = vpack.c.bf16 %v341_v48, %v323_v47  ;;  %v317_v53 = vsel %vm314_vm7, %v959_v33, %v969_v43  ;;  %v335_v54 = vsel %vm332_vm8, %v964_v31, %v974_v41 }
  0xaa   : > { %v984_v55 = vunpack.i.h.bf16 %v982_v49  ;;  %v983_v56 = vunpack.i.l.bf16 %v982_v49  ;;  %v979_v57 = vunpack.i.h.bf16 %v977_v50  ;;  %v978_v58 = vunpack.i.l.bf16 %v977_v50 }
  0xab   : > { %815 = vmatpush1.bf16.msra.mxu0 %v814_v51  ;;  %845 = vmatprep.subr.bf16.mxu1 %v844_v52  ;;  %v846_v59 = vpack.c.bf16 %v335_v54, %v317_v53 }
  0xac   : > { %v352_v60 = vsel %vm350_vm9, %v978_v58, %v979_v57  ;;  %v370_v61 = vsel %vm368_vm10, %v983_v56, %v984_v55 }
  0xad   : > { %847 = vmatpush1.bf16.msra.mxu1 %v846_v59  ;;  %v992_v62 = vpop.permute.xlu1 %991  ;;  %v987_v63 = vpop.permute.xlu0 %986  ;;  %v816_v0 = vpack.c.bf16 %v370_v61, %v352_v60 }
  0xae   : > { %v994_v1 = vunpack.i.h.bf16 %v992_v62  ;;  %v993_v2 = vunpack.i.l.bf16 %v992_v62  ;;  %v989_v3 = vunpack.i.h.bf16 %v987_v63  ;;  %v988_v4 = vunpack.i.l.bf16 %v987_v63  ;;  %v450_v62 = vld [vmem:[%s1195_s1] sm:$0xff] }
  0xaf   : > { %817 = vmatprep.subr.bf16.mxu0 %v816_v0  ;;  %v594_v63 = vlaneseq }
  0xb0   : > { %v351_v5 = vsel %vm350_vm9, %v988_v4, %v978_v58  ;;  %v369_v7 = vsel %vm368_vm10, %v993_v2, %v983_v56  ;;  %v359_v8 = vsel %vm350_vm9, %v989_v3, %v988_v4  ;;  %v377_v9 = vsel %vm368_vm10, %v994_v1, %v993_v2 }
  0xb1   : > { %v1002_v10 = vpop.permute.xlu1 %1001  ;;  %v997_v11 = vpop.permute.xlu0 %996  ;;  %v818_v12 = vpack.c.bf16 %v369_v7, %v351_v5  ;;  %v848_v13 = vpack.c.bf16 %v377_v9, %v359_v8  ;;  %v353_v14 = vsel %vm350_vm9, %v979_v57, %v989_v3  ;;  %v371_v15 = vsel %vm368_vm10, %v984_v55, %v994_v1 }
  0xb2   : > { %v1004_v16 = vunpack.i.h.bf16 %v1002_v10  ;;  %v1003_v17 = vunpack.i.l.bf16 %v1002_v10  ;;  %v999_v18 = vunpack.i.h.bf16 %v997_v11  ;;  %v998_v19 = vunpack.i.l.bf16 %v997_v11 }
  0xb3   : > { %819 = vmatpush1.bf16.msra.mxu0 %v818_v12  ;;  %849 = vmatprep.subr.bf16.mxu1 %v848_v13  ;;  %v850_v20 = vpack.c.bf16 %v371_v15, %v353_v14  ;;  %v595_v0 = vand.u32 127, %v594_v63  ;;  %v599_v1 = vstv %s783_s14 }
  0xb4   : > { %v388_v21 = vsel %vm386_vm11, %v998_v19, %v999_v18  ;;  %v406_v22 = vsel %vm404_vm12, %v1003_v17, %v1004_v16 }
  0xb5   : > { %851 = vmatpush1.bf16.msra.mxu1 %v850_v20  ;;  %v1012_v23 = vpop.permute.xlu1 %1011  ;;  %v1007_v24 = vpop.permute.xlu0 %1006  ;;  %v820_v25 = vpack.c.bf16 %v406_v22, %v388_v21  ;;  %v596_v2 = vadd.s32 128, %v595_v0  ;;  %v597_v3 = vadd.s32 256, %v595_v0  ;;  %v600_v4 = vadd.s32 %v599_v1, %v595_v0 }
  0xb6   : > { %v1014_v26 = vunpack.i.h.bf16 %v1012_v23  ;;  %v1013_v27 = vunpack.i.l.bf16 %v1012_v23  ;;  %v1009_v28 = vunpack.i.h.bf16 %v1007_v24  ;;  %v1008_v29 = vunpack.i.l.bf16 %v1007_v24 }
  0xb7   : > { %821 = vmatprep.subr.bf16.mxu0 %v820_v25  ;;  %v598_v5 = vadd.s32 384, %v595_v0  ;;  %v601_v7 = vadd.s32 %v599_v1, %v596_v2  ;;  %v602_v8 = vadd.s32 %v599_v1, %v597_v3  ;;  %v609_v9 = vsub.s32 0, %v600_v4 }
  0xb8   : > { %v387_v30 = vsel %vm386_vm11, %v1008_v29, %v998_v19  ;;  %v405_v31 = vsel %vm404_vm12, %v1013_v27, %v1003_v17  ;;  %v395_v32 = vsel %vm386_vm11, %v1009_v28, %v1008_v29  ;;  %v413_v33 = vsel %vm404_vm12, %v1014_v26, %v1013_v27 }
  0xb9   : > { %v1022_v34 = vpop.permute.xlu1 %1021  ;;  %v1017_v35 = vpop.permute.xlu0 %1016  ;;  %v822_v36 = vpack.c.bf16 %v405_v31, %v387_v30  ;;  %v852_v37 = vpack.c.bf16 %v413_v33, %v395_v32  ;;  %v389_v38 = vsel %vm386_vm11, %v999_v18, %v1009_v28  ;;  %v407_v39 = vsel %vm404_vm12, %v1004_v16, %v1014_v26 }
  0xba   : > { %v1024_v40 = vunpack.i.h.bf16 %v1022_v34  ;;  %v1023_v41 = vunpack.i.l.bf16 %v1022_v34  ;;  %v1019_v42 = vunpack.i.h.bf16 %v1017_v35  ;;  %v1018_v43 = vunpack.i.l.bf16 %v1017_v35 }
  0xbb   : > { %823 = vmatpush1.bf16.msra.mxu0 %v822_v36  ;;  %853 = vmatprep.subr.bf16.mxu1 %v852_v37  ;;  %v854_v44 = vpack.c.bf16 %v407_v39, %v389_v38  ;;  %v603_v10 = vadd.s32 %v599_v1, %v598_v5  ;;  %v616_v11 = vsub.s32 0, %v601_v7  ;;  %v623_v12 = vsub.s32 0, %v602_v8 }
  0xbc   : > { %v424_v45 = vsel %vm422_vm14, %v1018_v43, %v1019_v42  ;;  %v442_v46 = vsel %vm440_vm13, %v1023_v41, %v1024_v40  ;;  %v784_v13 = vmin.u32 %v609_v9, %v600_v4  ;;  %vm608_vm15 = vcmp.lt.s32.totalorder %v600_v4, 0 }
  0xbd   : > { %855 = vmatpush1.bf16.msra.mxu1 %v854_v44  ;;  %v433_v47 = vpop.permute.xlu1 %432  ;;  %v1027_v48 = vpop.permute.xlu0 %1026  ;;  %v824_v49 = vpack.c.bf16 %v442_v46, %v424_v45  ;;  %v630_v14 = vsub.s32 0, %v603_v10  ;;  %v785_v15 = vmin.u32 %v616_v11, %v601_v7  ;;  %v786_v16 = vmin.u32 %v623_v12, %v602_v8 }
  0xbe   : > { %v1029_v50 = vunpack.i.h.bf16 %v1027_v48  ;;  %v1028_v51 = vunpack.i.l.bf16 %v1027_v48  ;;  %v441_v52 = vsel %vm440_vm13, %v433_v47, %v1023_v41  ;;  %v612_v17 = vand.u32 63, %v784_v13 }
  0xbf   : > { %825 = vmatprep.subr.bf16.mxu0 %v824_v49  ;;  %v787_v18 = vmin.u32 %v630_v14, %v603_v10  ;;  %v619_v19 = vand.u32 63, %v785_v15  ;;  %v626_v20 = vand.u32 63, %v786_v16  ;;  %vm615_vm0 = vcmp.lt.s32.totalorder %v601_v7, 0 }
  0xc0   : > { %v423_v53 = vsel %vm422_vm14, %v1028_v51, %v1018_v43  ;;  %v425_v56 = vsel %vm422_vm14, %v1019_v42, %v1029_v50  ;;  %v431_v57 = vsel %vm422_vm14, %v1029_v50, %v1028_v51  ;;  %v613_v21 = vsub.s32 0, %v612_v17 }
  0xc1   : > { %v439_v54 = vpop.permute.xlu0 %438  ;;  %v826_v55 = vpack.c.bf16 %v441_v52, %v423_v53  ;;  %v633_v22 = vand.u32 63, %v787_v18  ;;  %v620_v23 = vsub.s32 0, %v619_v19  ;;  %v627_v24 = vsub.s32 0, %v626_v20 }
  0xc2   : > { %v443_v58 = vsel %vm440_vm13, %v1024_v40, %v439_v54  ;;  %v449_v59 = vsel %vm440_vm13, %v439_v54, %v433_v47  ;;  %v614_v25 = vsel %vm608_vm15, %v613_v21, %v612_v17  ;;  %vm622_vm1 = vcmp.lt.s32.totalorder %v602_v8, 0 }
  0xc3   : > { %v856_v60 = vpack.c.bf16 %v449_v59, %v431_v57  ;;  %v858_v61 = vpack.c.bf16 %v443_v58, %v425_v56  ;;  %827 = vmatpush1.bf16.msra.mxu0 %v826_v55  ;;  %v634_v26 = vsub.s32 0, %v633_v22  ;;  %v621_v27 = vsel %vm615_vm0, %v620_v23, %v619_v19 }
  0xc4   : > { %vm629_vm2 = vcmp.lt.s32.totalorder %v603_v10, 0  ;;  %vm636_vm3 = vcmp.ne.s32.totalorder %v614_v25, 0  ;;  %vm640_vm4 = vcmp.lt.s32.totalorder %v614_v25, 0  ;;  %v628_v28 = vsel %vm622_vm1, %v627_v24, %v626_v20 }
  0xc5   : > { %857 = vmatprep.subr.bf16.mxu1 %v856_v60  ;;  %vm637_vm5 = vcmp.ne.s32.totalorder %v621_v27, 0  ;;  %vm641_vm6 = vcmp.lt.s32.totalorder %v621_v27, 0  ;;  %v635_v29 = vsel %vm629_vm2, %v634_v26, %v633_v22  ;;  %v648_v30 = vadd.s32 64, %v614_v25  ;;  %vm644_vm7 = vmand %vm640_vm4, %vm636_vm3 }
  0xc6   : > { %516 = vmatmul.mubr.f32.vlgmr.msra.gmra.mrb[0].mxu0 %v450_v62  ;;  %859 = vmatpush1.bf16.msra.mxu1 %v858_v61  ;;  %v649_v31 = vadd.s32 64, %v621_v27  ;;  %vm638_vm8 = vcmp.ne.s32.totalorder %v628_v28, 0  ;;  %vm642_vm9 = vcmp.lt.s32.totalorder %v628_v28, 0  ;;  %vm645_vm10 = vmand %vm641_vm6, %vm637_vm5  ;;  %vm639_vm11 = vcmp.ne.s32.totalorder %v635_v29, 0 }
  0xc7   : > { %vm643_vm12 = vcmp.lt.s32.totalorder %v635_v29, 0  ;;  %v650_v32 = vadd.s32 64, %v628_v28  ;;  %v652_v33 = vsel %vm644_vm7, %v648_v30, %v614_v25  ;;  %vm646_vm13 = vmand %vm642_vm9, %vm638_vm8  ;;  %v651_v34 = vadd.s32 64, %v635_v29 }
  0xc8   : > { %v653_v35 = vsel %vm645_vm10, %v649_v31, %v621_v27  ;;  %vm647_vm14 = vmand %vm643_vm12, %vm639_vm11  ;;  %vm604_vm15 = vcmp.lt.s32.totalorder %v600_v4, 1024  ;;  %vm656_vm0 = vcmp.lt.s32.totalorder %v652_v33, 49  ;;  %vm605_vm1 = vcmp.lt.s32.totalorder %v601_v7, 1024 }
  0xc9   : > { %587 = vmatmul.mubr.f32.vlgmr.msra.gmra.mrb[0].mxu1 %v450_v62  ;;  %v654_v36 = vsel %vm646_vm13, %v650_v32, %v628_v28  ;;  %vm657_vm2 = vcmp.lt.s32.totalorder %v653_v35, 49  ;;  %v655_v37 = vsel %vm647_vm14, %v651_v34, %v635_v29  ;;  %vm660_vm3 = vmand %vm604_vm15, %vm656_vm0  ;;  %vm606_vm4 = vcmp.lt.s32.totalorder %v602_v8, 1024 }
  0xca   : > { %vm658_vm5 = vcmp.lt.s32.totalorder %v654_v36, 49  ;;  %vm661_vm6 = vmand %vm605_vm1, %vm657_vm2  ;;  %vm607_vm7 = vcmp.lt.s32.totalorder %v603_v10, 1024  ;;  %vm659_vm8 = vcmp.lt.s32.totalorder %v655_v37, 49  ;;  %v788_v38 = vsel %vm660_vm3, 1.0, %v1051_v6 }
  0xcb   : > { %vm662_vm9 = vmand %vm606_vm4, %vm658_vm5  ;;  %v789_v39 = vsel %vm661_vm6, 1.0, %v1051_v6  ;;  %vm690_vm11 = vcmask 7168   ;;  %vm696_vm12 = vcmask (!%p792_p4), 15360   ;;  %v1054_v62 = vmov (!%p792_p4), 0.0  }
  0xcc   : > { %vm663_vm10 = vmand %vm607_vm7, %vm659_vm8  ;;  %v790_v43 = vsel %vm662_vm9, 1.0, %v1051_v6  ;;  %697 = vst.msk [vmem:[#allocation2] sm:$0xff] (!%p792_p4), %vm696_vm12, %v1054_v62 }
  0xcd   : > { %v791_v45 = vsel %vm663_vm10, 1.0, %v1051_v6 }
 0x199   : > { %v517_v40 = vpop.f32.mrb[0].mxu0 }
 0x19a   : > { %v672_v41 = vmul.f32 %v788_v38, %v517_v40  ;;  %v519_v42 = vpop.f32.mrb[1].mxu0 }
 0x19b   : > { %v673_v44 = vmul.f32 %v789_v39, %v519_v42 }
 0x19c   : > { %v681_v46 = vmul.f32 %v672_v41, %v517_v40  ;;  %v588_v47 = vpop.f32.mrb[0].mxu1 }
 0x19d   : > { %v676_v48 = vadd.f32 %v673_v44, %v672_v41  ;;  %v682_v49 = vmul.f32 %v673_v44, %v519_v42  ;;  %v674_v50 = vmul.f32 %v790_v43, %v588_v47  ;;  %v590_v51 = vpop.f32.mrb[1].mxu1 }
 0x19e   : > { %v675_v52 = vmul.f32 %v791_v45, %v590_v51 }
 0x19f   : > { %v685_v53 = vadd.f32 %v682_v49, %v681_v46  ;;  %v683_v54 = vmul.f32 %v674_v50, %v588_v47  ;;  %v677_v55 = vadd.f32 %v676_v48, %v674_v50 }
 0x1a0   : > { %v684_v56 = vmul.f32 %v675_v52, %v590_v51 }
 0x1a1   : > { %v678_v57 = vadd.f32 %v677_v55, %v675_v52  ;;  %v686_v58 = vadd.f32 %v685_v53, %v683_v54 }
 0x1a3   : > { %679 = vadd.xlane.f32.xlu1 %v678_v57  ;;  %v687_v59 = vadd.f32 %v686_v58, %v684_v56 }
 0x1a5   : > { %688 = vadd.xlane.f32.xlu0 %v687_v59 }
 0x22d   : > { %695 = sbr.rel (%p792_p4) target bundleno = 564 (0x234), region = 32 }
 0x230   : > { %v680_v60 = vpop.xlane.xlu1 %679 }
 0x232   : > { %v689_v61 = vpop.xlane.xlu0 %688 }
 0x233   : > { %v691_v6 = vsel %vm690_vm11, %v680_v60, %v689_v61 }
 0x234 PF: > { %v698_v63 = vld [vmem:[#allocation2] sm:$0xff]  ;;  %vm700_vm13 = vcmask 15360   ;;  %p793_p5 = scmp.ne.s32.totalorder %s1081_s13, 1 }
 0x235   : > { %v699_v0 = vadd.f32 %v698_v63, %v691_v6 }
 0x236   : > { %705 = sbr.rel (%p793_p5) target bundleno = 576 (0x240), region = 36 }
 0x237   : > { %701 = vst.msk [vmem:[#allocation2] sm:$0xff] %vm700_vm13, %v699_v0 }
 0x23e   : > { %v706_v1 = vld [vmem:[#allocation2] sm:$0xff] }
 0x23f   : > { %707 = vst.msk [vmem:[%s1197_s3] sm:$0xff] %vm700_vm13, %v706_v1 }
 0x240 PF: > { %708 = vst [vmem:[%s1092_s21] sm:$0xff] %v517_v40  ;;  %709 = vst [vmem:[%s1092_s21 + $0x8] sm:$0xff] %v519_v42 }
 0x241   : > { %710 = vst [vmem:[%s1092_s21 + $0x10] sm:$0xff] %v588_v47  ;;  %711 = vst [vmem:[%s1092_s21 + $0x18] sm:$0xff] %v590_v51 }
 0x242 PF: > { %s14_s12 = sadd.s32 1, %s1036_s12  }
 0x243   : > { %p11_p6 = scmp.ge.s32.totalorder %s14_s12, 4  }
 0x245   :  { %13 = sbr.rel (!%p11_p6) target bundleno = 1 (0x1), region = 74 }

</bundles_post_ra>
